<compile_context>
chip_gen: v7x
topology: tpu7x:2x2x1
jax: 0.10.0
libtpu: 0.0.40
codegen_flags: <defaults>
</compile_context>

<pallas_src>
import functools
import math

import jax
import jax.numpy as jnp
from jax import lax
from jax.experimental import pallas as pl
from jax.experimental.pallas import tpu as pltpu

EPS = 1e-5                       # torch.nn.BatchNorm2d default eps
LANE = 128                       # TPU lane width


def _round_up(v, m):
    return (v + m - 1) // m * m


def _vmem_limit_bytes():
    # Generation-aware scoped-VMEM budget: ~48 MiB on v7x (64 MiB physical per
    # TensorCore), ~96 MiB on v5e / v6e (128 MiB physical).
    try:
        cap = int(pltpu.get_tpu_info().vmem_capacity_bytes)
    except Exception:            # conservative fallback, safe on every generation
        cap = 64 * 1024 * 1024
    return 96 * 1024 * 1024 if cap >= 128 * 1024 * 1024 else 48 * 1024 * 1024


def _pick_block_h(N, H, W, target_rows=2048):
    """Largest H-divisor tile with ~target matmul rows per step; keep the
    parallel step count N*Ht >= 2 and even when possible so the grid splits
    across 2 TensorCores on v7x."""
    divs = [d for d in range(1, H + 1) if H % d == 0]
    cands = [d for d in divs if d * W <= target_rows] or [1]
    d = max(cands)
    while (N * (H // d) < 2) or (N * (H // d)) % 2 == 1:
        smaller = [c for c in cands if c < d]
        if not smaller:
            break
        d = max(smaller)
    return d


# ---------------------------------------------------------------------------
# in-kernel helper: 3x3 conv over a (th+2, W, Cp) halo'd window, dj-grouped
# ---------------------------------------------------------------------------
def _conv3x3_grouped(win, w_ref, th, W, Cp):
    # win: (th+2, W, Cp) bf16; output row r uses window rows r..r+2.
    # w_ref: (3, 3*Cp, Cp) bf16 resident weights; w_ref[di][dj*Cp+cin, cout].
    # One lane-axis concat of the three W-shifted views gives a (., W, 3*Cp)
    # operand -> 3 MXU matmuls with K=3*Cp and only 3 f32 accumulator RMWs,
    # with the accumulator initialized by the first dot (no zero-fill pass).
    zc = jnp.zeros((th + 2, 1, Cp), win.dtype)
    winp = jnp.concatenate([zc, win, zc], axis=1)                     # (th+2, W+2, Cp)
    grouped = jnp.concatenate(
        [winp[:, 0:W], winp[:, 1:W + 1], winp[:, 2:W + 2]], axis=-1)  # (th+2, W, 3Cp)
    acc = jnp.dot(grouped[0:th].reshape(th * W, 3 * Cp), w_ref[0],
                  preferred_element_type=jnp.float32)
    for di in (1, 2):
        acc = acc + jnp.dot(grouped[di:di + th].reshape(th * W, 3 * Cp), w_ref[di],
                            preferred_element_type=jnp.float32)
    return acc                                                        # (th*W, Cp) f32


def _partial_stats(acc):
    # per-channel (sum, sum-of-squares) of this tile's f32 conv output
    return jnp.concatenate(
        [jnp.sum(acc, axis=0, keepdims=True),
         jnp.sum(acc * acc, axis=0, keepdims=True)], axis=0)          # (2, Cp)


# ---------------------------------------------------------------------------
# kernel 1: conv1 (3x3, bf16 MXU) + per-tile BN partial stats
# ---------------------------------------------------------------------------
def _conv_stats_kernel(xu_ref, xm_ref, xd_ref, w_ref, y_ref, st_ref, *, th, W, Cp):
    win = jnp.concatenate([xu_ref[0], xm_ref[0], xd_ref[0]], axis=0)  # (th+2, W, Cp)
    acc = _conv3x3_grouped(win, w_ref, th, W, Cp)
    y_ref[...] = acc.astype(jnp.bfloat16).reshape(1, th, W, Cp)       # bf16 HBM store
    st_ref[...] = _partial_stats(acc).reshape(1, 1, 2, Cp)            # f32-exact stats


# ---------------------------------------------------------------------------
# kernel 2: BN1-apply + ReLU (fused) -> conv2 (3x3, bf16 MXU) + per-tile stats
# ---------------------------------------------------------------------------
def _bn_relu_conv_stats_kernel(yu_ref, ym_ref, yd_ref, mu_ref, istd_ref, g_ref,
                               b_ref, w_ref, y_ref, st_ref, *, th, W, Cp):
    i = pl.program_id(1)
    scale = istd_ref[...] * g_ref[...]                 # (1, Cp) f32
    shift = b_ref[...] - mu_ref[...] * scale           # (1, Cp) f32

    def bn_relu(v):                                    # v: (rows, W, Cp)
        return jnp.maximum(v.astype(jnp.float32) * scale + shift, 0.0)

    # Halo rows at the image border must stay zero (conv zero-padding), not
    # BN(0); the side arrays hold zeros there, so mask after the affine map.
    top_ok = (i > 0).astype(jnp.float32)
    bot_ok = (i < pl.num_programs(1) - 1).astype(jnp.float32)
    hu = bn_relu(yu_ref[0]) * top_ok
    hd = bn_relu(yd_ref[0]) * bot_ok
    hm = bn_relu(ym_ref[0])
    win = jnp.concatenate([hu, hm, hd], axis=0).astype(jnp.bfloat16)
    acc = _conv3x3_grouped(win, w_ref, th, W, Cp)
    y_ref[...] = acc.astype(jnp.bfloat16).reshape(1, th, W, Cp)
    st_ref[...] = _partial_stats(acc).reshape(1, 1, 2, Cp)


# ---------------------------------------------------------------------------
# kernel 3: BN2-apply + ReLU + identity-shortcut add (pure elementwise)
# ---------------------------------------------------------------------------
def _bn_relu_add_kernel(y_ref, x_ref, mu_ref, istd_ref, g_ref, b_ref, o_ref):
    scale = istd_ref[...] * g_ref[...]
    shift = b_ref[...] - mu_ref[...] * scale
    h = jnp.maximum(y_ref[...].astype(jnp.float32) * scale + shift, 0.0)
    o_ref[...] = h + x_ref[...].astype(jnp.float32)


# ---------------------------------------------------------------------------
# wrappers
# ---------------------------------------------------------------------------
def _halo_rows(a, th, Ht):
    """Row above / below each H-tile of `a` (zeros at the image border)."""
    N, H, W, Cp = a.shape
    zero = jnp.zeros((N, 1, W, Cp), a.dtype)
    if Ht == 1:
        return zero, zero
    up = jnp.concatenate([zero, a[:, th - 1:H - 1:th]], axis=1)   # (N, Ht, W, Cp)
    dn = jnp.concatenate([a[:, th::th], zero], axis=1)            # (N, Ht, W, Cp)
    return up, dn


def _conv_stage(kernel, bn_params, mid, up, dn, w3, th, vmem_limit):
    N, H, W, Cp = mid.shape
    Ht = H // th
    isz = mid.dtype.itemsize
    tile_spec = pl.BlockSpec((1, th, W, Cp), lambda n, i: (n, i, 0, 0))
    halo_spec = pl.BlockSpec((1, 1, W, Cp), lambda n, i: (n, i, 0, 0))
    vec_spec = pl.BlockSpec((1, Cp), lambda n, i: (0, 0))            # resident
    w_spec = pl.BlockSpec((3, 3 * Cp, Cp), lambda n, i: (0, 0, 0))   # resident
    cost = pl.CostEstimate(
        flops=2 * 9 * N * H * W * Cp * Cp,
        transcendentals=0,
        bytes_accessed=(N * H * W * Cp * isz          # row tiles in
                        + 2 * N * Ht * W * Cp * isz   # halo rows in
                        + 9 * Cp * Cp * 2             # weights (bf16)
                        + N * H * W * Cp * 2          # bf16 conv output
                        + N * Ht * 2 * Cp * 4))       # partial stats
    return pl.pallas_call(
        functools.partial(kernel, th=th, W=W, Cp=Cp),
        grid=(N, Ht),
        in_specs=[halo_spec, tile_spec, halo_spec]
                 + [vec_spec] * len(bn_params) + [w_spec],
        out_specs=(tile_spec,
                   pl.BlockSpec((1, 1, 2, Cp), lambda n, i: (n, i, 0, 0))),
        out_shape=(jax.ShapeDtypeStruct((N, H, W, Cp), jnp.bfloat16),
                   jax.ShapeDtypeStruct((N, Ht, 2, Cp), jnp.float32)),
        compiler_params=pltpu.CompilerParams(
            dimension_semantics=("parallel", "parallel"),
            vmem_limit_bytes=vmem_limit),
        cost_estimate=cost,
    )(up, mid, dn, *bn_params, w3)


def _finalize_stats(st, count):
    # NOTE: E[x^2]-E[x]^2 in f32 can cancel for very large N*H*W with large
    # means; adequate for these activation scales / sizes.
    s = jnp.sum(st, axis=(0, 1))                           # (2, Cp)
    mean = s[0] / count
    var = jnp.maximum(s[1] / count - mean * mean, 0.0)     # biased var (train mode)
    inv_std = lax.rsqrt(var + EPS)
    return mean.reshape(1, -1), inv_std.reshape(1, -1)


def _prep_weight(w_oihw, Cp):
    c_out, c_in, _, _ = w_oihw.shape
    w = jnp.transpose(w_oihw, (2, 3, 1, 0))                # (3, 3, Cin, Cout)
    w = jnp.pad(w, ((0, 0), (0, 0), (0, Cp - c_in), (0, Cp - c_out)))
    # (3, 3*Cp, Cp): contraction axis grouped over dj -> [di][dj*Cp + cin, cout]
    return w.reshape(3, 3 * Cp, Cp).astype(jnp.bfloat16)


def _prep_vec(v, Cp):
    # Padded channels stay exactly zero through the block only because gamma
    # and beta are zero-padded (zero-variance channels give inv_std~1/sqrt(eps),
    # cancelled by gamma == 0).  Keep this padding scheme.
    C = v.shape[-1]
    return jnp.pad(v.reshape(1, C).astype(jnp.float32), ((0, 0), (0, Cp - C)))


@functools.partial(jax.jit, static_argnames=("block_h",))
def pcresblock2_forward(x_nchw, params, block_h=None):
    N, C, H, W = x_nchw.shape
    Cp = _round_up(C, LANE)            # lane-dense channel axis
    if block_h is None:
        block_h = _pick_block_h(N, H, W)
    assert H % block_h == 0, "block_h must divide H"
    th, Ht = block_h, H // block_h
    M = N * H * W                      # BN sample count (no padded rows exist)
    vmem_limit = _vmem_limit_bytes()

    # NCHW -> NHWC, bf16, channels zero-padded (no separate f32 copy of x).
    x_bf = jnp.transpose(x_nchw, (0, 2, 3, 1)).astype(jnp.bfloat16)
    x_bf = jnp.pad(x_bf, ((0, 0), (0, 0), (0, 0), (0, Cp - C)))

    w1 = _prep_weight(params["w1"], Cp)
    w2 = _prep_weight(params["w2"], Cp)
    g1, b1 = _prep_vec(params["bn1_g"], Cp), _prep_vec(params["bn1_b"], Cp)
    g2, b2 = _prep_vec(params["bn2_g"], Cp), _prep_vec(params["bn2_b"], Cp)

    # stage 1: conv1 + partial batch stats (y1 stored bf16, stats from f32 acc)
    xu, xd = _halo_rows(x_bf, th, Ht)
    y1, st1 = _conv_stage(_conv_stats_kernel, [], x_bf, xu, xd, w1, th, vmem_limit)
    mu1, istd1 = _finalize_stats(st1, M)

    # stage 2: BN1+ReLU fused into conv2 + partial batch stats
    yu, yd = _halo_rows(y1, th, Ht)
    y2, st2 = _conv_stage(_bn_relu_conv_stats_kernel, [mu1, istd1, g1, b1],
                          y1, yu, yd, w2, th, vmem_limit)
    mu2, istd2 = _finalize_stats(st2, M)

    # stage 3: BN2+ReLU + identity-shortcut add (bf16 in, f32 out)
    tile_spec = pl.BlockSpec((1, th, W, Cp), lambda n, i: (n, i, 0, 0))
    vec_spec = pl.BlockSpec((1, Cp), lambda n, i: (0, 0))
    out = pl.pallas_call(
        _bn_relu_add_kernel,
        grid=(N, Ht),
        in_specs=[tile_spec, tile_spec, vec_spec, vec_spec, vec_spec, vec_spec],
        out_specs=tile_spec,
        out_shape=jax.ShapeDtypeStruct((N, H, W, Cp), jnp.float32),
        compiler_params=pltpu.CompilerParams(
            dimension_semantics=("parallel", "parallel"),
            vmem_limit_bytes=vmem_limit),
        cost_estimate=pl.CostEstimate(
            flops=6 * N * H * W * Cp, transcendentals=0,
            bytes_accessed=N * H * W * Cp * (2 + 2 + 4)),
    )(y2, x_bf, mu2, istd2, g2, b2)

    return jnp.transpose(out[:, :, :, :C], (0, 3, 1, 2))   # NHWC -> NCHW


# ---------------------------------------------------------------------------
# parameters (faithful to the PyTorch module's _initialize_weights)
# ---------------------------------------------------------------------------
def init_params(key, C):
    k1, k2 = jax.random.split(key)
    std = math.sqrt(2.0 / (9 * C))     # kaiming_normal_(mode='fan_out', relu)
    return dict(
        w1=jax.random.normal(k1, (C, C, 3, 3), jnp.float32) * std,
        bn1_g=jnp.ones((C,), jnp.float32),
        bn1_b=jnp.zeros((C,), jnp.float32),
        w2=jax.random.normal(k2, (C, C, 3, 3), jnp.float32) * std,
        bn2_g=jnp.ones((C,), jnp.float32),
        bn2_b=jnp.zeros((C,), jnp.float32),
    )


# ---------------------------------------------------------------------------
# pure-JAX reference (f32 path with bf16 matmuls, like the torch semantics)
# ---------------------------------------------------------------------------
def reference_forward(x_nchw, params):
    x = jnp.transpose(x_nchw, (0, 2, 3, 1)).astype(jnp.float32)
    C = x.shape[-1]

    def conv3x3(h, w_oihw):
        w = jnp.transpose(w_oihw, (2, 3, 1, 0)).astype(jnp.bfloat16)
        return lax.conv_general_dilated(
            h.astype(jnp.bfloat16), w, window_strides=(1, 1), padding="SAME",
            dimension_numbers=("NHWC", "HWIO", "NHWC"),
            preferred_element_type=jnp.float32)

    def bn_relu(y, g, b):
        mean = jnp.mean(y, axis=(0, 1, 2), keepdims=True)
        var = jnp.mean((y - mean) ** 2, axis=(0, 1, 2), keepdims=True)
        yn = (y - mean) * lax.rsqrt(var + EPS)
        return jnp.maximum(yn * g.reshape(1, 1, 1, C) + b.reshape(1, 1, 1, C), 0.0)

    h = bn_relu(conv3x3(x, params["w1"]), params["bn1_g"], params["bn1_b"])
    h = bn_relu(conv3x3(h, params["w2"]), params["bn2_g"], params["bn2_b"])
    return jnp.transpose(h + x, (0, 3, 1, 2))


if __name__ == "__main__":
    key = jax.random.PRNGKey(0)
    N, C, H, W = 2, 8, 16, 16      # stride=1, in_ch == out_ch -> identity shortcut
    kx, kp = jax.random.split(key)
    x = jax.random.normal(kx, (N, C, H, W), jnp.float32)
    params = init_params(kp, C)

    # block_h=4 -> grid (2, 4) per conv stage: exercises tiling + halo handling.
    out = pcresblock2_forward(x, params, block_h=4)
    out = jax.block_until_ready(out)
    assert out.shape == (N, C, H, W), out.shape

    ref = reference_forward(x, params)
    err = float(jnp.max(jnp.abs(out - ref)))
    assert err < 5e-2, f"max |err| = {err}"
    print("KERNEL_OK")
</pallas_src>

<mosaic_0001>
module attributes {stable_mosaic.version = 11 : i64} {
  func.func @_conv_stats_kernel(%arg0: i32, %arg1: i32, %arg2: memref<1x1x16x128xbf16, #tpu.memory_space<vmem>>, %arg3: memref<1x4x16x128xbf16, #tpu.memory_space<vmem>>, %arg4: memref<1x1x16x128xbf16, #tpu.memory_space<vmem>>, %arg5: memref<3x384x128xbf16, #tpu.memory_space<vmem>>, %arg6: memref<1x4x16x128xbf16, #tpu.memory_space<vmem>>, %arg7: memref<1x1x2x128xf32, #tpu.memory_space<vmem>>) attributes {dimension_semantics = [#tpu.dimension_semantics<parallel>, #tpu.dimension_semantics<parallel>], iteration_bounds = array<i64: 2, 4>, scalar_prefetch = 0 : i64, scratch_operands = 0 : i64, tpu.core_type = #tpu.core_type<tc>, window_params = [{transform_indices = @transform_0, window_bounds = array<i64: 1, 1, 16, 128>}, {transform_indices = @transform_1, window_bounds = array<i64: 1, 4, 16, 128>}, {transform_indices = @transform_2, window_bounds = array<i64: 1, 1, 16, 128>}, {pipeline_mode = #tpu.pipeline_mode<synchronous>, transform_indices = @transform_3, window_bounds = array<i64: 3, 384, 128>}, {transform_indices = @transform_4, window_bounds = array<i64: 1, 4, 16, 128>}, {transform_indices = @transform_5, window_bounds = array<i64: 1, 1, 2, 128>}]} {
    %c0 = arith.constant 0 : index
    %c0_0 = arith.constant 0 : index
    %c0_1 = arith.constant 0 : index
    %c0_2 = arith.constant 0 : index
    %0 = vector.load %arg2[%c0, %c0_0, %c0_1, %c0_2] : memref<1x1x16x128xbf16, #tpu.memory_space<vmem>>, vector<1x1x16x128xbf16>
    %1 = vector.shape_cast %0 : vector<1x1x16x128xbf16> to vector<1x16x128xbf16>
    %c0_3 = arith.constant 0 : index
    %c0_4 = arith.constant 0 : index
    %c0_5 = arith.constant 0 : index
    %c0_6 = arith.constant 0 : index
    %2 = vector.load %arg3[%c0_3, %c0_4, %c0_5, %c0_6] : memref<1x4x16x128xbf16, #tpu.memory_space<vmem>>, vector<1x4x16x128xbf16>
    %3 = vector.shape_cast %2 : vector<1x4x16x128xbf16> to vector<4x16x128xbf16>
    %c0_7 = arith.constant 0 : index
    %c0_8 = arith.constant 0 : index
    %c0_9 = arith.constant 0 : index
    %c0_10 = arith.constant 0 : index
    %4 = vector.load %arg4[%c0_7, %c0_8, %c0_9, %c0_10] : memref<1x1x16x128xbf16, #tpu.memory_space<vmem>>, vector<1x1x16x128xbf16>
    %5 = vector.shape_cast %4 : vector<1x1x16x128xbf16> to vector<1x16x128xbf16>
    %6 = tpu.concatenate %1, %3, %5 in 0 : vector<1x16x128xbf16>, vector<4x16x128xbf16>, vector<1x16x128xbf16> -> vector<6x16x128xbf16>
    %cst = arith.constant 0.000000e+00 : bf16
    %7 = vector.broadcast %cst : bf16 to vector<6x1x128xbf16>
    %8 = tpu.concatenate %7, %6, %7 in 1 : vector<6x1x128xbf16>, vector<6x16x128xbf16>, vector<6x1x128xbf16> -> vector<6x18x128xbf16>
    %9 = vector.extract_strided_slice %8 {offsets = [0, 0, 0], sizes = [6, 16, 128], strides = [1, 1, 1]} : vector<6x18x128xbf16> to vector<6x16x128xbf16>
    %10 = vector.extract_strided_slice %8 {offsets = [0, 1, 0], sizes = [6, 16, 128], strides = [1, 1, 1]} : vector<6x18x128xbf16> to vector<6x16x128xbf16>
    %11 = vector.extract_strided_slice %8 {offsets = [0, 2, 0], sizes = [6, 16, 128], strides = [1, 1, 1]} : vector<6x18x128xbf16> to vector<6x16x128xbf16>
    %12 = tpu.concatenate %9, %10, %11 in 2 : vector<6x16x128xbf16>, vector<6x16x128xbf16>, vector<6x16x128xbf16> -> vector<6x16x384xbf16>
    %13 = vector.extract_strided_slice %12 {offsets = [0, 0, 0], sizes = [4, 16, 384], strides = [1, 1, 1]} : vector<6x16x384xbf16> to vector<4x16x384xbf16>
    %14 = vector.shape_cast %13 : vector<4x16x384xbf16> to vector<64x384xbf16>
    %c0_11 = arith.constant 0 : index
    %c0_12 = arith.constant 0 : index
    %c0_13 = arith.constant 0 : index
    %15 = vector.load %arg5[%c0_11, %c0_12, %c0_13] : memref<3x384x128xbf16, #tpu.memory_space<vmem>>, vector<1x384x128xbf16>
    %16 = vector.shape_cast %15 : vector<1x384x128xbf16> to vector<384x128xbf16>
    %cst_14 = arith.constant dense<0.000000e+00> : vector<64x128xf32>
    %17 = tpu.matmul %14, %16, %cst_14 {dimension_numbers = #tpu.dot_dimension_numbers<[1], [0], [0], [1], [0, 0, 1, 1], [], []>} : vector<64x384xbf16>, vector<384x128xbf16>, vector<64x128xf32> -> vector<64x128xf32>
    %18 = vector.extract_strided_slice %12 {offsets = [1, 0, 0], sizes = [4, 16, 384], strides = [1, 1, 1]} : vector<6x16x384xbf16> to vector<4x16x384xbf16>
    %19 = vector.shape_cast %18 : vector<4x16x384xbf16> to vector<64x384xbf16>
    %c1 = arith.constant 1 : index
    %c0_15 = arith.constant 0 : index
    %c0_16 = arith.constant 0 : index
    %20 = vector.load %arg5[%c1, %c0_15, %c0_16] : memref<3x384x128xbf16, #tpu.memory_space<vmem>>, vector<1x384x128xbf16>
    %21 = vector.shape_cast %20 : vector<1x384x128xbf16> to vector<384x128xbf16>
    %cst_17 = arith.constant dense<0.000000e+00> : vector<64x128xf32>
    %22 = tpu.matmul %19, %21, %cst_17 {dimension_numbers = #tpu.dot_dimension_numbers<[1], [0], [0], [1], [0, 0, 1, 1], [], []>} : vector<64x384xbf16>, vector<384x128xbf16>, vector<64x128xf32> -> vector<64x128xf32>
    %23 = arith.addf %17, %22 : vector<64x128xf32>
    %24 = vector.extract_strided_slice %12 {offsets = [2, 0, 0], sizes = [4, 16, 384], strides = [1, 1, 1]} : vector<6x16x384xbf16> to vector<4x16x384xbf16>
    %25 = vector.shape_cast %24 : vector<4x16x384xbf16> to vector<64x384xbf16>
    %c2 = arith.constant 2 : index
    %c0_18 = arith.constant 0 : index
    %c0_19 = arith.constant 0 : index
    %26 = vector.load %arg5[%c2, %c0_18, %c0_19] : memref<3x384x128xbf16, #tpu.memory_space<vmem>>, vector<1x384x128xbf16>
    %27 = vector.shape_cast %26 : vector<1x384x128xbf16> to vector<384x128xbf16>
    %cst_20 = arith.constant dense<0.000000e+00> : vector<64x128xf32>
    %28 = tpu.matmul %25, %27, %cst_20 {dimension_numbers = #tpu.dot_dimension_numbers<[1], [0], [0], [1], [0, 0, 1, 1], [], []>} : vector<64x384xbf16>, vector<384x128xbf16>, vector<64x128xf32> -> vector<64x128xf32>
    %29 = arith.addf %23, %28 : vector<64x128xf32>
    %30 = arith.truncf %29 : vector<64x128xf32> to vector<64x128xbf16>
    %31 = vector.shape_cast %30 : vector<64x128xbf16> to vector<1x4x16x128xbf16>
    %c0_21 = arith.constant 0 : index
    %c0_22 = arith.constant 0 : index
    %c0_23 = arith.constant 0 : index
    %c0_24 = arith.constant 0 : index
    %32 = vector.load %arg6[%c0_21, %c0_22, %c0_23, %c0_24] : memref<1x4x16x128xbf16, #tpu.memory_space<vmem>>, vector<1x4x16x128xbf16>
    tpu.vector_store %arg6[%c0_21, %c0_22, %c0_23, %c0_24], %31 {strides = array<i32>} : memref<1x4x16x128xbf16, #tpu.memory_space<vmem>>, vector<1x4x16x128xbf16>,
    %cst_25 = arith.constant dense<0.000000e+00> : vector<128xf32>
    %33 = vector.multi_reduction <add>, %29, %cst_25 [0] : vector<64x128xf32> to vector<128xf32>
    %34 = vector.shape_cast %33 : vector<128xf32> to vector<1x128xf32>
    %35 = arith.mulf %29, %29 : vector<64x128xf32>
    %cst_26 = arith.constant dense<0.000000e+00> : vector<128xf32>
    %36 = vector.multi_reduction <add>, %35, %cst_26 [0] : vector<64x128xf32> to vector<128xf32>
    %37 = vector.shape_cast %36 : vector<128xf32> to vector<1x128xf32>
    %38 = tpu.concatenate %34, %37 in 0 : vector<1x128xf32>, vector<1x128xf32> -> vector<2x128xf32>
    %39 = vector.shape_cast %38 : vector<2x128xf32> to vector<1x1x2x128xf32>
    %c0_27 = arith.constant 0 : index
    %c0_28 = arith.constant 0 : index
    %c0_29 = arith.constant 0 : index
    %c0_30 = arith.constant 0 : index
    %40 = vector.load %arg7[%c0_27, %c0_28, %c0_29, %c0_30] : memref<1x1x2x128xf32, #tpu.memory_space<vmem>>, vector<1x1x2x128xf32>
    tpu.vector_store %arg7[%c0_27, %c0_28, %c0_29, %c0_30], %39 {strides = array<i32>} : memref<1x1x2x128xf32, #tpu.memory_space<vmem>>, vector<1x1x2x128xf32>,
    return
  }
  func.func @transform_0(%arg0: i32, %arg1: i32) -> (i32, i32, i32, i32) {
    %c0_i32 = arith.constant 0 : i32
    %c0_i32_0 = arith.constant 0 : i32
    %c0_i32_1 = arith.constant 0 : i32
    return %arg0, %arg1, %c0_i32, %c0_i32_0 : i32, i32, i32, i32
  }
  func.func @transform_1(%arg0: i32, %arg1: i32) -> (i32, i32, i32, i32) {
    %c0_i32 = arith.constant 0 : i32
    %c0_i32_0 = arith.constant 0 : i32
    %c0_i32_1 = arith.constant 0 : i32
    return %arg0, %arg1, %c0_i32, %c0_i32_0 : i32, i32, i32, i32
  }
  func.func @transform_2(%arg0: i32, %arg1: i32) -> (i32, i32, i32, i32) {
    %c0_i32 = arith.constant 0 : i32
    %c0_i32_0 = arith.constant 0 : i32
    %c0_i32_1 = arith.constant 0 : i32
    return %arg0, %arg1, %c0_i32, %c0_i32_0 : i32, i32, i32, i32
  }
  func.func @transform_3(%arg0: i32, %arg1: i32) -> (i32, i32, i32) {
    %c0_i32 = arith.constant 0 : i32
    %c0_i32_0 = arith.constant 0 : i32
    %c0_i32_1 = arith.constant 0 : i32
    %c0_i32_2 = arith.constant 0 : i32
    return %c0_i32, %c0_i32_0, %c0_i32_1 : i32, i32, i32
  }
  func.func @transform_4(%arg0: i32, %arg1: i32) -> (i32, i32, i32, i32) {
    %c0_i32 = arith.constant 0 : i32
    %c0_i32_0 = arith.constant 0 : i32
    %c0_i32_1 = arith.constant 0 : i32
    return %arg0, %arg1, %c0_i32, %c0_i32_0 : i32, i32, i32, i32
  }
  func.func @transform_5(%arg0: i32, %arg1: i32) -> (i32, i32, i32, i32) {
    %c0_i32 = arith.constant 0 : i32
    %c0_i32_0 = arith.constant 0 : i32
    %c0_i32_1 = arith.constant 0 : i32
    return %arg0, %arg1, %c0_i32, %c0_i32_0 : i32, i32, i32, i32
  }
}

module attributes {stable_mosaic.version = 11 : i64} {
  func.func @_bn_relu_add_kernel(%arg0: i32, %arg1: i32, %arg2: memref<1x4x16x128xbf16, #tpu.memory_space<vmem>>, %arg3: memref<1x4x16x128xbf16, #tpu.memory_space<vmem>>, %arg4: memref<1x128xf32, #tpu.memory_space<vmem>>, %arg5: memref<1x128xf32, #tpu.memory_space<vmem>>, %arg6: memref<1x128xf32, #tpu.memory_space<vmem>>, %arg7: memref<1x128xf32, #tpu.memory_space<vmem>>, %arg8: memref<1x4x16x128xf32, #tpu.memory_space<vmem>>) attributes {dimension_semantics = [#tpu.dimension_semantics<parallel>, #tpu.dimension_semantics<parallel>], iteration_bounds = array<i64: 2, 4>, scalar_prefetch = 0 : i64, scratch_operands = 0 : i64, tpu.core_type = #tpu.core_type<tc>, window_params = [{transform_indices = @transform_0, window_bounds = array<i64: 1, 4, 16, 128>}, {transform_indices = @transform_1, window_bounds = array<i64: 1, 4, 16, 128>}, {pipeline_mode = #tpu.pipeline_mode<synchronous>, transform_indices = @transform_2, window_bounds = array<i64: 1, 128>}, {pipeline_mode = #tpu.pipeline_mode<synchronous>, transform_indices = @transform_3, window_bounds = array<i64: 1, 128>}, {pipeline_mode = #tpu.pipeline_mode<synchronous>, transform_indices = @transform_4, window_bounds = array<i64: 1, 128>}, {pipeline_mode = #tpu.pipeline_mode<synchronous>, transform_indices = @transform_5, window_bounds = array<i64: 1, 128>}, {transform_indices = @transform_6, window_bounds = array<i64: 1, 4, 16, 128>}]} {
    %c0 = arith.constant 0 : index
    %c0_0 = arith.constant 0 : index
    %0 = vector.load %arg5[%c0, %c0_0] : memref<1x128xf32, #tpu.memory_space<vmem>>, vector<1x128xf32>
    %c0_1 = arith.constant 0 : index
    %c0_2 = arith.constant 0 : index
    %1 = vector.load %arg6[%c0_1, %c0_2] : memref<1x128xf32, #tpu.memory_space<vmem>>, vector<1x128xf32>
    %2 = arith.mulf %0, %1 : vector<1x128xf32>
    %c0_3 = arith.constant 0 : index
    %c0_4 = arith.constant 0 : index
    %3 = vector.load %arg7[%c0_3, %c0_4] : memref<1x128xf32, #tpu.memory_space<vmem>>, vector<1x128xf32>
    %c0_5 = arith.constant 0 : index
    %c0_6 = arith.constant 0 : index
    %4 = vector.load %arg4[%c0_5, %c0_6] : memref<1x128xf32, #tpu.memory_space<vmem>>, vector<1x128xf32>
    %5 = arith.mulf %4, %2 : vector<1x128xf32>
    %6 = arith.subf %3, %5 : vector<1x128xf32>
    %c0_7 = arith.constant 0 : index
    %c0_8 = arith.constant 0 : index
    %c0_9 = arith.constant 0 : index
    %c0_10 = arith.constant 0 : index
    %7 = vector.load %arg2[%c0_7, %c0_8, %c0_9, %c0_10] : memref<1x4x16x128xbf16, #tpu.memory_space<vmem>>, vector<1x4x16x128xbf16>
    %8 = arith.extf %7 : vector<1x4x16x128xbf16> to vector<1x4x16x128xf32>
    %9 = vector.shape_cast %2 : vector<1x128xf32> to vector<1x1x1x128xf32>
    %10 = vector.broadcast %9 : vector<1x1x1x128xf32> to vector<1x4x16x128xf32>
    %11 = arith.mulf %8, %10 : vector<1x4x16x128xf32>
    %12 = vector.shape_cast %6 : vector<1x128xf32> to vector<1x1x1x128xf32>
    %13 = vector.broadcast %12 : vector<1x1x1x128xf32> to vector<1x4x16x128xf32>
    %14 = arith.addf %11, %13 : vector<1x4x16x128xf32>
    %cst = arith.constant 0.000000e+00 : f32
    %15 = vector.broadcast %cst : f32 to vector<1x4x16x128xf32>
    %16 = arith.maximumf %14, %15 : vector<1x4x16x128xf32>
    %c0_11 = arith.constant 0 : index
    %c0_12 = arith.constant 0 : index
    %c0_13 = arith.constant 0 : index
    %c0_14 = arith.constant 0 : index
    %17 = vector.load %arg3[%c0_11, %c0_12, %c0_13, %c0_14] : memref<1x4x16x128xbf16, #tpu.memory_space<vmem>>, vector<1x4x16x128xbf16>
    %18 = arith.extf %17 : vector<1x4x16x128xbf16> to vector<1x4x16x128xf32>
    %19 = arith.addf %16, %18 : vector<1x4x16x128xf32>
    %c0_15 = arith.constant 0 : index
    %c0_16 = arith.constant 0 : index
    %c0_17 = arith.constant 0 : index
    %c0_18 = arith.constant 0 : index
    %20 = vector.load %arg8[%c0_15, %c0_16, %c0_17, %c0_18] : memref<1x4x16x128xf32, #tpu.memory_space<vmem>>, vector<1x4x16x128xf32>
    tpu.vector_store %arg8[%c0_15, %c0_16, %c0_17, %c0_18], %19 {strides = array<i32>} : memref<1x4x16x128xf32, #tpu.memory_space<vmem>>, vector<1x4x16x128xf32>,
    return
  }
  func.func @transform_0(%arg0: i32, %arg1: i32) -> (i32, i32, i32, i32) {
    %c0_i32 = arith.constant 0 : i32
    %c0_i32_0 = arith.constant 0 : i32
    %c0_i32_1 = arith.constant 0 : i32
    return %arg0, %arg1, %c0_i32, %c0_i32_0 : i32, i32, i32, i32
  }
  func.func @transform_1(%arg0: i32, %arg1: i32) -> (i32, i32, i32, i32) {
    %c0_i32 = arith.constant 0 : i32
    %c0_i32_0 = arith.constant 0 : i32
    %c0_i32_1 = arith.constant 0 : i32
    return %arg0, %arg1, %c0_i32, %c0_i32_0 : i32, i32, i32, i32
  }
  func.func @transform_2(%arg0: i32, %arg1: i32) -> (i32, i32) {
    %c0_i32 = arith.constant 0 : i32
    %c0_i32_0 = arith.constant 0 : i32
    %c0_i32_1 = arith.constant 0 : i32
    return %c0_i32, %c0_i32_0 : i32, i32
  }
  func.func @transform_3(%arg0: i32, %arg1: i32) -> (i32, i32) {
    %c0_i32 = arith.constant 0 : i32
    %c0_i32_0 = arith.constant 0 : i32
    %c0_i32_1 = arith.constant 0 : i32
    return %c0_i32, %c0_i32_0 : i32, i32
  }
  func.func @transform_4(%arg0: i32, %arg1: i32) -> (i32, i32) {
    %c0_i32 = arith.constant 0 : i32
    %c0_i32_0 = arith.constant 0 : i32
    %c0_i32_1 = arith.constant 0 : i32
    return %c0_i32, %c0_i32_0 : i32, i32
  }
  func.func @transform_5(%arg0: i32, %arg1: i32) -> (i32, i32) {
    %c0_i32 = arith.constant 0 : i32
    %c0_i32_0 = arith.constant 0 : i32
    %c0_i32_1 = arith.constant 0 : i32
    return %c0_i32, %c0_i32_0 : i32, i32
  }
  func.func @transform_6(%arg0: i32, %arg1: i32) -> (i32, i32, i32, i32) {
    %c0_i32 = arith.constant 0 : i32
    %c0_i32_0 = arith.constant 0 : i32
    %c0_i32_1 = arith.constant 0 : i32
    return %arg0, %arg1, %c0_i32, %c0_i32_0 : i32, i32, i32, i32
  }
}

module attributes {stable_mosaic.version = 11 : i64} {
  func.func @_bn_relu_conv_stats_kernel(%arg0: i32, %arg1: i32, %arg2: memref<1x1x16x128xbf16, #tpu.memory_space<vmem>>, %arg3: memref<1x4x16x128xbf16, #tpu.memory_space<vmem>>, %arg4: memref<1x1x16x128xbf16, #tpu.memory_space<vmem>>, %arg5: memref<1x128xf32, #tpu.memory_space<vmem>>, %arg6: memref<1x128xf32, #tpu.memory_space<vmem>>, %arg7: memref<1x128xf32, #tpu.memory_space<vmem>>, %arg8: memref<1x128xf32, #tpu.memory_space<vmem>>, %arg9: memref<3x384x128xbf16, #tpu.memory_space<vmem>>, %arg10: memref<1x4x16x128xbf16, #tpu.memory_space<vmem>>, %arg11: memref<1x1x2x128xf32, #tpu.memory_space<vmem>>) attributes {dimension_semantics = [#tpu.dimension_semantics<parallel>, #tpu.dimension_semantics<parallel>], iteration_bounds = array<i64: 2, 4>, scalar_prefetch = 0 : i64, scratch_operands = 0 : i64, tpu.core_type = #tpu.core_type<tc>, window_params = [{transform_indices = @transform_0, window_bounds = array<i64: 1, 1, 16, 128>}, {transform_indices = @transform_1, window_bounds = array<i64: 1, 4, 16, 128>}, {transform_indices = @transform_2, window_bounds = array<i64: 1, 1, 16, 128>}, {pipeline_mode = #tpu.pipeline_mode<synchronous>, transform_indices = @transform_3, window_bounds = array<i64: 1, 128>}, {pipeline_mode = #tpu.pipeline_mode<synchronous>, transform_indices = @transform_4, window_bounds = array<i64: 1, 128>}, {pipeline_mode = #tpu.pipeline_mode<synchronous>, transform_indices = @transform_5, window_bounds = array<i64: 1, 128>}, {pipeline_mode = #tpu.pipeline_mode<synchronous>, transform_indices = @transform_6, window_bounds = array<i64: 1, 128>}, {pipeline_mode = #tpu.pipeline_mode<synchronous>, transform_indices = @transform_7, window_bounds = array<i64: 3, 384, 128>}, {transform_indices = @transform_8, window_bounds = array<i64: 1, 4, 16, 128>}, {transform_indices = @transform_9, window_bounds = array<i64: 1, 1, 2, 128>}]} {
    %c0 = arith.constant 0 : index
    %c0_0 = arith.constant 0 : index
    %0 = vector.load %arg6[%c0, %c0_0] : memref<1x128xf32, #tpu.memory_space<vmem>>, vector<1x128xf32>
    %c0_1 = arith.constant 0 : index
    %c0_2 = arith.constant 0 : index
    %1 = vector.load %arg7[%c0_1, %c0_2] : memref<1x128xf32, #tpu.memory_space<vmem>>, vector<1x128xf32>
    %2 = arith.mulf %0, %1 : vector<1x128xf32>
    %c0_3 = arith.constant 0 : index
    %c0_4 = arith.constant 0 : index
    %3 = vector.load %arg8[%c0_3, %c0_4] : memref<1x128xf32, #tpu.memory_space<vmem>>, vector<1x128xf32>
    %c0_5 = arith.constant 0 : index
    %c0_6 = arith.constant 0 : index
    %4 = vector.load %arg5[%c0_5, %c0_6] : memref<1x128xf32, #tpu.memory_space<vmem>>, vector<1x128xf32>
    %5 = arith.mulf %4, %2 : vector<1x128xf32>
    %6 = arith.subf %3, %5 : vector<1x128xf32>
    %c0_i32 = arith.constant 0 : i32
    %7 = arith.cmpi sgt, %arg1, %c0_i32 : i32
    %8 = arith.extui %7 : i1 to i32
    %9 = arith.sitofp %8 : i32 to f32
    %c3_i32 = arith.constant 3 : i32
    %10 = arith.cmpi slt, %arg1, %c3_i32 : i32
    %11 = arith.extui %10 : i1 to i32
    %12 = arith.sitofp %11 : i32 to f32
    %c0_7 = arith.constant 0 : index
    %c0_8 = arith.constant 0 : index
    %c0_9 = arith.constant 0 : index
    %c0_10 = arith.constant 0 : index
    %13 = vector.load %arg2[%c0_7, %c0_8, %c0_9, %c0_10] : memref<1x1x16x128xbf16, #tpu.memory_space<vmem>>, vector<1x1x16x128xbf16>
    %14 = vector.shape_cast %13 : vector<1x1x16x128xbf16> to vector<1x16x128xbf16>
    %15 = arith.extf %14 : vector<1x16x128xbf16> to vector<1x16x128xf32>
    %16 = vector.shape_cast %2 : vector<1x128xf32> to vector<1x1x128xf32>
    %17 = vector.broadcast %16 : vector<1x1x128xf32> to vector<1x16x128xf32>
    %18 = arith.mulf %15, %17 : vector<1x16x128xf32>
    %19 = vector.shape_cast %6 : vector<1x128xf32> to vector<1x1x128xf32>
    %20 = vector.broadcast %19 : vector<1x1x128xf32> to vector<1x16x128xf32>
    %21 = arith.addf %18, %20 : vector<1x16x128xf32>
    %cst = arith.constant 0.000000e+00 : f32
    %22 = vector.broadcast %cst : f32 to vector<1x16x128xf32>
    %23 = arith.maximumf %21, %22 : vector<1x16x128xf32>
    %24 = vector.broadcast %9 : f32 to vector<1x16x128xf32>
    %25 = arith.mulf %23, %24 : vector<1x16x128xf32>
    %c0_11 = arith.constant 0 : index
    %c0_12 = arith.constant 0 : index
    %c0_13 = arith.constant 0 : index
    %c0_14 = arith.constant 0 : index
    %26 = vector.load %arg4[%c0_11, %c0_12, %c0_13, %c0_14] : memref<1x1x16x128xbf16, #tpu.memory_space<vmem>>, vector<1x1x16x128xbf16>
    %27 = vector.shape_cast %26 : vector<1x1x16x128xbf16> to vector<1x16x128xbf16>
    %28 = arith.extf %27 : vector<1x16x128xbf16> to vector<1x16x128xf32>
    %29 = vector.shape_cast %2 : vector<1x128xf32> to vector<1x1x128xf32>
    %30 = vector.broadcast %29 : vector<1x1x128xf32> to vector<1x16x128xf32>
    %31 = arith.mulf %28, %30 : vector<1x16x128xf32>
    %32 = vector.shape_cast %6 : vector<1x128xf32> to vector<1x1x128xf32>
    %33 = vector.broadcast %32 : vector<1x1x128xf32> to vector<1x16x128xf32>
    %34 = arith.addf %31, %33 : vector<1x16x128xf32>
    %cst_15 = arith.constant 0.000000e+00 : f32
    %35 = vector.broadcast %cst_15 : f32 to vector<1x16x128xf32>
    %36 = arith.maximumf %34, %35 : vector<1x16x128xf32>
    %37 = vector.broadcast %12 : f32 to vector<1x16x128xf32>
    %38 = arith.mulf %36, %37 : vector<1x16x128xf32>
    %c0_16 = arith.constant 0 : index
    %c0_17 = arith.constant 0 : index
    %c0_18 = arith.constant 0 : index
    %c0_19 = arith.constant 0 : index
    %39 = vector.load %arg3[%c0_16, %c0_17, %c0_18, %c0_19] : memref<1x4x16x128xbf16, #tpu.memory_space<vmem>>, vector<1x4x16x128xbf16>
    %40 = vector.shape_cast %39 : vector<1x4x16x128xbf16> to vector<4x16x128xbf16>
    %41 = arith.extf %40 : vector<4x16x128xbf16> to vector<4x16x128xf32>
    %42 = vector.shape_cast %2 : vector<1x128xf32> to vector<1x1x128xf32>
    %43 = vector.broadcast %42 : vector<1x1x128xf32> to vector<4x16x128xf32>
    %44 = arith.mulf %41, %43 : vector<4x16x128xf32>
    %45 = vector.shape_cast %6 : vector<1x128xf32> to vector<1x1x128xf32>
    %46 = vector.broadcast %45 : vector<1x1x128xf32> to vector<4x16x128xf32>
    %47 = arith.addf %44, %46 : vector<4x16x128xf32>
    %cst_20 = arith.constant 0.000000e+00 : f32
    %48 = vector.broadcast %cst_20 : f32 to vector<4x16x128xf32>
    %49 = arith.maximumf %47, %48 : vector<4x16x128xf32>
    %50 = tpu.concatenate %25, %49, %38 in 0 : vector<1x16x128xf32>, vector<4x16x128xf32>, vector<1x16x128xf32> -> vector<6x16x128xf32>
    %51 = arith.truncf %50 : vector<6x16x128xf32> to vector<6x16x128xbf16>
    %cst_21 = arith.constant 0.000000e+00 : bf16
    %52 = vector.broadcast %cst_21 : bf16 to vector<6x1x128xbf16>
    %53 = tpu.concatenate %52, %51, %52 in 1 : vector<6x1x128xbf16>, vector<6x16x128xbf16>, vector<6x1x128xbf16> -> vector<6x18x128xbf16>
    %54 = vector.extract_strided_slice %53 {offsets = [0, 0, 0], sizes = [6, 16, 128], strides = [1, 1, 1]} : vector<6x18x128xbf16> to vector<6x16x128xbf16>
    %55 = vector.extract_strided_slice %53 {offsets = [0, 1, 0], sizes = [6, 16, 128], strides = [1, 1, 1]} : vector<6x18x128xbf16> to vector<6x16x128xbf16>
    %56 = vector.extract_strided_slice %53 {offsets = [0, 2, 0], sizes = [6, 16, 128], strides = [1, 1, 1]} : vector<6x18x128xbf16> to vector<6x16x128xbf16>
    %57 = tpu.concatenate %54, %55, %56 in 2 : vector<6x16x128xbf16>, vector<6x16x128xbf16>, vector<6x16x128xbf16> -> vector<6x16x384xbf16>
    %58 = vector.extract_strided_slice %57 {offsets = [0, 0, 0], sizes = [4, 16, 384], strides = [1, 1, 1]} : vector<6x16x384xbf16> to vector<4x16x384xbf16>
    %59 = vector.shape_cast %58 : vector<4x16x384xbf16> to vector<64x384xbf16>
    %c0_22 = arith.constant 0 : index
    %c0_23 = arith.constant 0 : index
    %c0_24 = arith.constant 0 : index
    %60 = vector.load %arg9[%c0_22, %c0_23, %c0_24] : memref<3x384x128xbf16, #tpu.memory_space<vmem>>, vector<1x384x128xbf16>
    %61 = vector.shape_cast %60 : vector<1x384x128xbf16> to vector<384x128xbf16>
    %cst_25 = arith.constant dense<0.000000e+00> : vector<64x128xf32>
    %62 = tpu.matmul %59, %61, %cst_25 {dimension_numbers = #tpu.dot_dimension_numbers<[1], [0], [0], [1], [0, 0, 1, 1], [], []>} : vector<64x384xbf16>, vector<384x128xbf16>, vector<64x128xf32> -> vector<64x128xf32>
    %63 = vector.extract_strided_slice %57 {offsets = [1, 0, 0], sizes = [4, 16, 384], strides = [1, 1, 1]} : vector<6x16x384xbf16> to vector<4x16x384xbf16>
    %64 = vector.shape_cast %63 : vector<4x16x384xbf16> to vector<64x384xbf16>
    %c1 = arith.constant 1 : index
    %c0_26 = arith.constant 0 : index
    %c0_27 = arith.constant 0 : index
    %65 = vector.load %arg9[%c1, %c0_26, %c0_27] : memref<3x384x128xbf16, #tpu.memory_space<vmem>>, vector<1x384x128xbf16>
    %66 = vector.shape_cast %65 : vector<1x384x128xbf16> to vector<384x128xbf16>
    %cst_28 = arith.constant dense<0.000000e+00> : vector<64x128xf32>
    %67 = tpu.matmul %64, %66, %cst_28 {dimension_numbers = #tpu.dot_dimension_numbers<[1], [0], [0], [1], [0, 0, 1, 1], [], []>} : vector<64x384xbf16>, vector<384x128xbf16>, vector<64x128xf32> -> vector<64x128xf32>
    %68 = arith.addf %62, %67 : vector<64x128xf32>
    %69 = vector.extract_strided_slice %57 {offsets = [2, 0, 0], sizes = [4, 16, 384], strides = [1, 1, 1]} : vector<6x16x384xbf16> to vector<4x16x384xbf16>
    %70 = vector.shape_cast %69 : vector<4x16x384xbf16> to vector<64x384xbf16>
    %c2 = arith.constant 2 : index
    %c0_29 = arith.constant 0 : index
    %c0_30 = arith.constant 0 : index
    %71 = vector.load %arg9[%c2, %c0_29, %c0_30] : memref<3x384x128xbf16, #tpu.memory_space<vmem>>, vector<1x384x128xbf16>
    %72 = vector.shape_cast %71 : vector<1x384x128xbf16> to vector<384x128xbf16>
    %cst_31 = arith.constant dense<0.000000e+00> : vector<64x128xf32>
    %73 = tpu.matmul %70, %72, %cst_31 {dimension_numbers = #tpu.dot_dimension_numbers<[1], [0], [0], [1], [0, 0, 1, 1], [], []>} : vector<64x384xbf16>, vector<384x128xbf16>, vector<64x128xf32> -> vector<64x128xf32>
    %74 = arith.addf %68, %73 : vector<64x128xf32>
    %75 = arith.truncf %74 : vector<64x128xf32> to vector<64x128xbf16>
    %76 = vector.shape_cast %75 : vector<64x128xbf16> to vector<1x4x16x128xbf16>
    %c0_32 = arith.constant 0 : index
    %c0_33 = arith.constant 0 : index
    %c0_34 = arith.constant 0 : index
    %c0_35 = arith.constant 0 : index
    %77 = vector.load %arg10[%c0_32, %c0_33, %c0_34, %c0_35] : memref<1x4x16x128xbf16, #tpu.memory_space<vmem>>, vector<1x4x16x128xbf16>
    tpu.vector_store %arg10[%c0_32, %c0_33, %c0_34, %c0_35], %76 {strides = array<i32>} : memref<1x4x16x128xbf16, #tpu.memory_space<vmem>>, vector<1x4x16x128xbf16>,
    %cst_36 = arith.constant dense<0.000000e+00> : vector<128xf32>
    %78 = vector.multi_reduction <add>, %74, %cst_36 [0] : vector<64x128xf32> to vector<128xf32>
    %79 = vector.shape_cast %78 : vector<128xf32> to vector<1x128xf32>
    %80 = arith.mulf %74, %74 : vector<64x128xf32>
    %cst_37 = arith.constant dense<0.000000e+00> : vector<128xf32>
    %81 = vector.multi_reduction <add>, %80, %cst_37 [0] : vector<64x128xf32> to vector<128xf32>
    %82 = vector.shape_cast %81 : vector<128xf32> to vector<1x128xf32>
    %83 = tpu.concatenate %79, %82 in 0 : vector<1x128xf32>, vector<1x128xf32> -> vector<2x128xf32>
    %84 = vector.shape_cast %83 : vector<2x128xf32> to vector<1x1x2x128xf32>
    %c0_38 = arith.constant 0 : index
    %c0_39 = arith.constant 0 : index
    %c0_40 = arith.constant 0 : index
    %c0_41 = arith.constant 0 : index
    %85 = vector.load %arg11[%c0_38, %c0_39, %c0_40, %c0_41] : memref<1x1x2x128xf32, #tpu.memory_space<vmem>>, vector<1x1x2x128xf32>
    tpu.vector_store %arg11[%c0_38, %c0_39, %c0_40, %c0_41], %84 {strides = array<i32>} : memref<1x1x2x128xf32, #tpu.memory_space<vmem>>, vector<1x1x2x128xf32>,
    return
  }
  func.func @transform_0(%arg0: i32, %arg1: i32) -> (i32, i32, i32, i32) {
    %c0_i32 = arith.constant 0 : i32
    %c0_i32_0 = arith.constant 0 : i32
    %c0_i32_1 = arith.constant 0 : i32
    return %arg0, %arg1, %c0_i32, %c0_i32_0 : i32, i32, i32, i32
  }
  func.func @transform_1(%arg0: i32, %arg1: i32) -> (i32, i32, i32, i32) {
    %c0_i32 = arith.constant 0 : i32
    %c0_i32_0 = arith.constant 0 : i32
    %c0_i32_1 = arith.constant 0 : i32
    return %arg0, %arg1, %c0_i32, %c0_i32_0 : i32, i32, i32, i32
  }
  func.func @transform_2(%arg0: i32, %arg1: i32) -> (i32, i32, i32, i32) {
    %c0_i32 = arith.constant 0 : i32
    %c0_i32_0 = arith.constant 0 : i32
    %c0_i32_1 = arith.constant 0 : i32
    return %arg0, %arg1, %c0_i32, %c0_i32_0 : i32, i32, i32, i32
  }
  func.func @transform_3(%arg0: i32, %arg1: i32) -> (i32, i32) {
    %c0_i32 = arith.constant 0 : i32
    %c0_i32_0 = arith.constant 0 : i32
    %c0_i32_1 = arith.constant 0 : i32
    return %c0_i32, %c0_i32_0 : i32, i32
  }
  func.func @transform_4(%arg0: i32, %arg1: i32) -> (i32, i32) {
    %c0_i32 = arith.constant 0 : i32
    %c0_i32_0 = arith.constant 0 : i32
    %c0_i32_1 = arith.constant 0 : i32
    return %c0_i32, %c0_i32_0 : i32, i32
  }
  func.func @transform_5(%arg0: i32, %arg1: i32) -> (i32, i32) {
    %c0_i32 = arith.constant 0 : i32
    %c0_i32_0 = arith.constant 0 : i32
    %c0_i32_1 = arith.constant 0 : i32
    return %c0_i32, %c0_i32_0 : i32, i32
  }
  func.func @transform_6(%arg0: i32, %arg1: i32) -> (i32, i32) {
    %c0_i32 = arith.constant 0 : i32
    %c0_i32_0 = arith.constant 0 : i32
    %c0_i32_1 = arith.constant 0 : i32
    return %c0_i32, %c0_i32_0 : i32, i32
  }
  func.func @transform_7(%arg0: i32, %arg1: i32) -> (i32, i32, i32) {
    %c0_i32 = arith.constant 0 : i32
    %c0_i32_0 = arith.constant 0 : i32
    %c0_i32_1 = arith.constant 0 : i32
    %c0_i32_2 = arith.constant 0 : i32
    return %c0_i32, %c0_i32_0, %c0_i32_1 : i32, i32, i32
  }
  func.func @transform_8(%arg0: i32, %arg1: i32) -> (i32, i32, i32, i32) {
    %c0_i32 = arith.constant 0 : i32
    %c0_i32_0 = arith.constant 0 : i32
    %c0_i32_1 = arith.constant 0 : i32
    return %arg0, %arg1, %c0_i32, %c0_i32_0 : i32, i32, i32, i32
  }
  func.func @transform_9(%arg0: i32, %arg1: i32) -> (i32, i32, i32, i32) {
    %c0_i32 = arith.constant 0 : i32
    %c0_i32_0 = arith.constant 0 : i32
    %c0_i32_1 = arith.constant 0 : i32
    return %arg0, %arg1, %c0_i32, %c0_i32_0 : i32, i32, i32, i32
  }
}

</mosaic_0001>

<bundles_post_ra>
// kernel: pcresblock2_forward.5
= control target key start
LH: loop header
LB: loop body
LE: loop exit
PB: predicated region body
PF: predicated region fallthrough
CT: control target
= control target key end

     0   :  { %s718_s21 = smov 0   ;;  %s720_s22 = smov 0   ;;  %s788_s0 = inlined_call_operand.vmem [shape: bf16[2,16,16,128], index: 0, kind: input, shape index: {}]   ;;  %s789_s1 = inlined_call_operand.vmem [shape: bf16[2,16,16,128], index: 1, kind: input, shape index: {}]   ;;  %s790_s2 = inlined_call_operand.vmem [shape: f32[1,128], index: 2, kind: input, shape index: {}]   ;;  %s791_s3 = inlined_call_operand.vmem [shape: f32[1,128], index: 3, kind: input, shape index: {}]   ;;  %s792_s4 = inlined_call_operand.vmem [shape: f32[1,128], index: 4, kind: input, shape index: {}]   ;;  %s793_s5 = inlined_call_operand.vmem [shape: f32[1,128], index: 5, kind: input, shape index: {}]   ;;  %s794_s6 = inlined_call_operand.vmem [shape: f32[2,16,16,128], index: 6, kind: output, shape index: {}]  }
   0x1   :  { %s722_s23 = smov 0   ;;  %s724_s24 = smov 0  }
   0x2   :  { %s726_s25 = smov 0  }
   0x3 LB: > { %s25_s26 = sadd.s32 1, %s673_s23  ;;  %s28_s27 = sadd.s32 1, %s677_s24  ;;  %s681_s25 = sphi %s726_s25, %s16_s25   ;;  %s677_s24 = sphi %s724_s24, %s798_s24   ;;  %s673_s23 = sphi %s722_s23, %s797_s23   ;;  %s669_s22 = sphi %s720_s22, %s796_s22   ;;  %s665_s21 = sphi %s718_s21, %s795_s21  }
   0x4   : > { %p26_p0 = scmp.ge.s32.totalorder %s25_s26, 4  ;;  %p550_p1 = scmp.ge.s32.totalorder %s681_s25, 1 }
   0x5   : > { %p252_p2 = scmp.lt.s32.totalorder %s681_s25, 9 }
   0x6   : > { %s800_s26 = smov (%p26_p0, %s25_s26), 0  ;;  %s802_s27 = smov (!%p26_p0, %s28_s27), %s677_s24 }
   0x7   : > { %p253_p3 = pnand %p550_p1, %p252_p2  ;;  %p30_p4 = scmp.ge.s32.totalorder %s802_s27, 2 }
   0x8   : > { %s551_s28 = sshll.u32 (!%p253_p3), %s665_s21, 2  ;;  %p303_p5 = scmp.lt.s32.totalorder (!%p253_p3), %s669_s22, 1  ;;  %v335_v0 = vld [vmem:[%s791_s3] sm:$0x1] (!%p253_p3)  ;;  %v359_v2 = vlaneseq (!%p253_p3) }
   0x9   : > { %s804_s27 = smov (%p30_p4, %s802_s27), 0  ;;  %256 = sbr.rel (%p253_p3) target bundleno = 40 (0x28), region = 44 }
   0xa   : > { %v336_v1 = vld [vmem:[%s792_s4] sm:$0x1] (!%p253_p3)  ;;  %p305_p6 = scmp.lt.s32.totalorder (!%p253_p3), %s551_s28, 15  ;;  %v360_v6 = vshrl.u32 (!%p253_p3), %v359_v2, 7 }
   0xb   : > { %v337_v3 = vmul.f32 (!%p253_p3), %v336_v1, %v335_v0  ;;  %v339_v4 = vld [vmem:[%s790_s2] sm:$0x1] (!%p253_p3) }
   0xc   : > { %v338_v5 = vld [vmem:[%s793_s5] sm:$0x1] (!%p253_p3)  ;;  %v361_v8 = vsub.s32 (!%p253_p3), 0, %v360_v6 }
   0xd   : > { %v340_v7 = vmul.f32 (!%p253_p3), %v339_v4, %v337_v3 }
   0xe   : > { %v362_v10 = vrot.slane (!%p253_p3), %v337_v3, %v361_v8 }
   0xf   : > { %v341_v9 = vsub.f32 (!%p253_p3), %v338_v5, %v340_v7 }
  0x10   : > { %s806_s22 = smov (!%p303_p5, %s669_s22), 1  ;;  %s808_s28 = smov (!%p305_p6, %s551_s28), 15 }
  0x11   : > { %s553_s13 = sshll.u32 %s806_s22, 5  ;;  %s552_s14 = sshll.u32 %s808_s28, 1  ;;  %v376_v12 = vrot.slane %v341_v9, %v361_v8 }
  0x12   : > { %s760_s15 = sadd.s32 %s553_s13, %s552_s14 }
  0x13   : > { %s554_s16 = sshll.u32 %s760_s15, 2  ;;  %s562_s22 = sshll.u32 %s760_s15, 3 }
  0x14   : > { %s311_s19 = scalar_lea.vmem %s788_s0, %s554_s16  ;;  %s322_s29 = scalar_lea.vmem %s789_s1, %s554_s16 }
  0x15   : > { %v566_v11 = vld [vmem:[%s311_s19] sm:$0xff]   ;;  %v597_v14 = vld [vmem:[%s311_s19 + $0x8] sm:$0xff]   ;;  %v598_v20 = vld [vmem:[%s311_s19 + $0x10] sm:$0xff]   ;;  %s333_s7 = scalar_lea.vmem %s794_s6, %s562_s22 }
  0x16   : > { %v582_v13 = vld [vmem:[%s322_s29] sm:$0xff]   ;;  %v567_v15 = vunpack.c.l.bf16 %v566_v11  ;;  %v568_v17 = vunpack.c.h.bf16 %v566_v11  ;;  %v600_v19 = vld [vmem:[%s322_s29 + $0x8] sm:$0xff]   ;;  %v601_v21 = vld [vmem:[%s322_s29 + $0x10] sm:$0xff]   ;;  %v571_v22 = vunpack.c.l.bf16 %v597_v14  ;;  %v572_v24 = vunpack.c.h.bf16 %v597_v14 }
  0x17   : > { %v583_v16 = vunpack.c.l.bf16 %v582_v13  ;;  %v584_v18 = vunpack.c.h.bf16 %v582_v13  ;;  %v587_v23 = vunpack.c.l.bf16 %v600_v19  ;;  %v588_v25 = vunpack.c.h.bf16 %v600_v19  ;;  %v599_v26 = vld [vmem:[%s311_s19 + $0x18] sm:$0xff]  }
  0x18   : > { %v364_v27 = vmul.f32 %v567_v15, %v362_v10  ;;  %v365_v28 = vmul.f32 %v568_v17, %v362_v10  ;;  %v575_v29 = vunpack.c.l.bf16 %v598_v20  ;;  %v591_v30 = vunpack.c.l.bf16 %v601_v21  ;;  %v602_v31 = vld [vmem:[%s322_s29 + $0x18] sm:$0xff]  }
  0x19   : > { %v366_v32 = vmul.f32 %v571_v22, %v362_v10  ;;  %v367_v33 = vmul.f32 %v572_v24, %v362_v10  ;;  %v576_v34 = vunpack.c.h.bf16 %v598_v20  ;;  %v592_v35 = vunpack.c.h.bf16 %v601_v21 }
  0x1a   : > { %v378_v36 = vadd.f32 %v376_v12, %v364_v27  ;;  %v379_v37 = vadd.f32 %v376_v12, %v365_v28  ;;  %v368_v38 = vmul.f32 %v575_v29, %v362_v10  ;;  %v579_v39 = vunpack.c.l.bf16 %v599_v26 }
  0x1b   : > { %v380_v40 = vadd.f32 %v376_v12, %v366_v32  ;;  %v381_v41 = vadd.f32 %v376_v12, %v367_v33  ;;  %v369_v42 = vmul.f32 %v576_v34, %v362_v10  ;;  %v595_v43 = vunpack.c.l.bf16 %v602_v31 }
  0x1c   : > { %v386_v44 = vmax.f32 %v378_v36, 0.0  ;;  %v387_v45 = vmax.f32 %v379_v37, 0.0  ;;  %v382_v46 = vadd.f32 %v376_v12, %v368_v38  ;;  %v370_v47 = vmul.f32 %v579_v39, %v362_v10 }
  0x1d   : > { %v388_v48 = vmax.f32 %v380_v40, 0.0  ;;  %v389_v49 = vmax.f32 %v381_v41, 0.0  ;;  %v383_v50 = vadd.f32 %v376_v12, %v369_v42  ;;  %v580_v51 = vunpack.c.h.bf16 %v599_v26 }
  0x1e   : > { %v410_v52 = vadd.f32 %v583_v16, %v386_v44  ;;  %v411_v53 = vadd.f32 %v584_v18, %v387_v45  ;;  %v390_v54 = vmax.f32 %v382_v46, 0.0  ;;  %v384_v55 = vadd.f32 %v376_v12, %v370_v47 }
  0x1f   : > { %v412_v56 = vadd.f32 %v587_v23, %v388_v48  ;;  %v413_v57 = vadd.f32 %v588_v25, %v389_v49  ;;  %v391_v58 = vmax.f32 %v383_v50, 0.0  ;;  %v371_v59 = vmul.f32 %v580_v51, %v362_v10 }
  0x20   : > { %418 = vst [vmem:[%s333_s7] sm:$0xff] %v410_v52  ;;  %419 = vst [vmem:[%s333_s7 + $0x8] sm:$0xff] %v411_v53  ;;  %v414_v60 = vadd.f32 %v591_v30, %v390_v54  ;;  %v392_v61 = vmax.f32 %v384_v55, 0.0  ;;  %v596_v0 = vunpack.c.h.bf16 %v602_v31 }
  0x21   : > { %420 = vst [vmem:[%s333_s7 + $0x10] sm:$0xff] %v412_v56  ;;  %421 = vst [vmem:[%s333_s7 + $0x18] sm:$0xff] %v413_v57  ;;  %v415_v62 = vadd.f32 %v592_v35, %v391_v58  ;;  %v385_v63 = vadd.f32 %v376_v12, %v371_v59 }
  0x22   : > { %422 = vst [vmem:[%s333_s7 + $0x20] sm:$0xff] %v414_v60  ;;  %v416_v1 = vadd.f32 %v595_v43, %v392_v61 }
  0x23   : > { %423 = vst [vmem:[%s333_s7 + $0x28] sm:$0xff] %v415_v62  ;;  %v393_v2 = vmax.f32 %v385_v63, 0.0 }
  0x24   : > { %424 = vst [vmem:[%s333_s7 + $0x30] sm:$0xff] %v416_v1 }
  0x25   : > { %v417_v3 = vadd.f32 %v596_v0, %v393_v2 }
  0x27   : > { %425 = vst [vmem:[%s333_s7 + $0x38] sm:$0xff] %v417_v3 }
  0x28 PF: > { %s16_s25 = sadd.s32 1, %s681_s25   ;;  %s795_s21 = smov %s673_s23 }
  0x29   : > { %p13_p7 = scmp.ge.s32.totalorder %s16_s25, 10   ;;  %s796_s22 = smov %s677_s24 }
  0x2a   : > { %s797_s23 = smov %s800_s26  ;;  %s798_s24 = smov %s804_s27 }
  0x2b   :  { %15 = sbr.rel (!%p13_p7) target bundleno = 3 (0x3), region = 77 }

// kernel: pcresblock2_forward.3
= control target key start
LH: loop header
LB: loop body
LE: loop exit
PB: predicated region body
PF: predicated region fallthrough
CT: control target
= control target key end

     0   :  { %s2519_s18 = smov 0   ;;  %s2521_s19 = smov 0   ;;  %s2954_s0 = inlined_call_operand.vmem [shape: bf16[2,4,16,128], index: 0, kind: input, shape index: {}]   ;;  %s2955_s1 = inlined_call_operand.vmem [shape: bf16[2,16,16,128], index: 1, kind: input, shape index: {}]   ;;  %s2956_s2 = inlined_call_operand.vmem [shape: bf16[2,4,16,128], index: 2, kind: input, shape index: {}]   ;;  %s2957_s3 = inlined_call_operand.vmem [shape: bf16[3,384,128], index: 3, kind: input, shape index: {}]   ;;  %s2958_s4 = inlined_call_operand.vmem [shape: bf16[2,16,16,128], index: 4, kind: output, shape index: {0}]   ;;  %s2959_s5 = inlined_call_operand.vmem [shape: f32[2,4,2,128], index: 5, kind: output, shape index: {1}]  }
   0x1   :  { %s2523_s20 = smov 0   ;;  %s2525_s21 = smov 0  }
   0x2   :  { %s2527_s22 = smov 0  }
   0x3 LB: > { %s25_s23 = sadd.s32 1, %s2479_s20  ;;  %s28_s24 = sadd.s32 1, %s2483_s21  ;;  %s2487_s22 = sphi %s2527_s22, %s16_s22   ;;  %s2483_s21 = sphi %s2525_s21, %s2965_s21   ;;  %s2479_s20 = sphi %s2523_s20, %s2964_s20   ;;  %s2475_s19 = sphi %s2521_s19, %s2963_s19   ;;  %s2471_s18 = sphi %s2519_s18, %s2962_s18  }
   0x4   : > { %p26_p0 = scmp.ge.s32.totalorder %s25_s23, 4  ;;  %p1831_p1 = scmp.ge.s32.totalorder %s2487_s22, 1 }
   0x5   : > { %p246_p2 = scmp.lt.s32.totalorder %s2487_s22, 9 }
   0x6   : > { %s2967_s23 = smov (%p26_p0, %s25_s23), 0  ;;  %s2969_s24 = smov (!%p26_p0, %s28_s24), %s2483_s21 }
   0x7   : > { %p247_p3 = pnand %p1831_p1, %p246_p2  ;;  %p30_p4 = scmp.ge.s32.totalorder %s2969_s24, 2 }
   0x8   : > { %v2371_v0 = vld [vmem:[%s2957_s3 + $0x100] sm:$0xff] (!%p247_p3)   ;;  %p310_p5 = scmp.lt.s32.totalorder (!%p247_p3), %s2475_s19, 1  ;;  %s1835_s29 = sshll.u32 (!%p247_p3), %s2471_s18, 2  ;;  %v2374_v3 = vld [vmem:[%s2957_s3 + $0x108] sm:$0xff] (!%p247_p3)   ;;  %v2377_v6 = vld [vmem:[%s2957_s3 + $0x110] sm:$0xff] (!%p247_p3)   ;;  %vm455_vm0 = vcmask (!%p247_p3), 1040384  }
   0x9   : > { %s2971_s24 = smov (%p30_p4, %s2969_s24), 0  ;;  %250 = sbr.rel (%p247_p3) target bundleno = 371 (0x173), region = 36 }
   0xa   : > { %v2372_v1 = vld [vmem:[%s2957_s3 + $0x140] sm:$0xff] (!%p247_p3)   ;;  %2063 = vmatprep.subr.bf16.mxu0 (!%p247_p3), %v2371_v0  ;;  %p322_p6 = scmp.lt.s32.totalorder (!%p247_p3), %s1835_s29, 15  ;;  %v2375_v4 = vld [vmem:[%s2957_s3 + $0x148] sm:$0xff] (!%p247_p3)   ;;  %v2378_v7 = vld [vmem:[%s2957_s3 + $0x150] sm:$0xff] (!%p247_p3)   ;;  %p312_p7 = scmp.lt.s32.totalorder (!%p247_p3), %s2471_s18, 3  ;;  %vm561_vm3 = vcmask (!%p247_p3), 1046528  }
   0xb   : > { %v2373_v2 = vld [vmem:[%s2957_s3 + $0xc0] sm:$0xff] (!%p247_p3)   ;;  %2219 = vmatprep.subr.bf16.mxu1 (!%p247_p3), %v2372_v1  ;;  %v2376_v5 = vld [vmem:[%s2957_s3 + $0xc8] sm:$0xff] (!%p247_p3)   ;;  %v2379_v8 = vld [vmem:[%s2957_s3 + $0xd0] sm:$0xff] (!%p247_p3)   ;;  %vm456_vm1 = vsmask.f32 (!%p247_p3), 256 }
   0xc   : > { %2064 = vmatpush3.bf16.msra.mxu0 (!%p247_p3), %v2373_v2  ;;  %2220 = vmatpush3.bf16.msra.mxu1 (!%p247_p3), %v2372_v1  ;;  %v2380_v9 = vld [vmem:[%s2957_s3 + $0x118] sm:$0xff] (!%p247_p3)   ;;  %v2383_v12 = vld [vmem:[%s2957_s3 + $0x120] sm:$0xff] (!%p247_p3)   ;;  %v2386_v15 = vld [vmem:[%s2957_s3 + $0x128] sm:$0xff] (!%p247_p3)   ;;  %vm470_vm4 = vsmask.f32 (!%p247_p3), 7424 }
   0xd   : > { %2065 = vmatprep.subr.bf16.mxu0 (!%p247_p3), %v2374_v3  ;;  %2221 = vmatprep.subr.bf16.mxu1 (!%p247_p3), %v2375_v4  ;;  %v2381_v10 = vld [vmem:[%s2957_s3 + $0x158] sm:$0xff] (!%p247_p3)   ;;  %v2384_v13 = vld [vmem:[%s2957_s3 + $0x160] sm:$0xff] (!%p247_p3)   ;;  %v2387_v16 = vld [vmem:[%s2957_s3 + $0x168] sm:$0xff] (!%p247_p3)  }
   0xe   : > { %v2382_v11 = vld [vmem:[%s2957_s3 + $0xd8] sm:$0xff] (!%p247_p3)   ;;  %v2385_v14 = vld [vmem:[%s2957_s3 + $0xe0] sm:$0xff] (!%p247_p3)   ;;  %v2388_v17 = vld [vmem:[%s2957_s3 + $0xe8] sm:$0xff] (!%p247_p3)  }
   0xf   : > { %v2389_v18 = vld [vmem:[%s2957_s3 + $0x130] sm:$0xff] (!%p247_p3)   ;;  %v2392_v22 = vld [vmem:[%s2957_s3 + $0x138] sm:$0xff] (!%p247_p3)   ;;  %vm2647_vm2 = vmand (!%p247_p3), %vm455_vm0, %vm456_vm1 }
  0x10   : > { %s2973_s19 = smov (!%p310_p5, %s2475_s19), 1  ;;  %s2975_s29 = smov (!%p322_p6, %s1835_s29), 15  ;;  %2066 = vmatpush3.bf16.msra.mxu0 %v2376_v5  ;;  %2222 = vmatpush3.bf16.msra.mxu1 %v2375_v4  ;;  %v2390_v19 = vld [vmem:[%s2957_s3 + $0x170] sm:$0xff]   ;;  %v2393_v23 = vld [vmem:[%s2957_s3 + $0x178] sm:$0xff]   ;;  %v2396_v28 = vld [vmem:[%s2957_s3 + $0x40] sm:$0xff]  }
  0x11   : > { %2067 = vmatprep.subr.bf16.mxu0 %v2377_v6  ;;  %2223 = vmatprep.subr.bf16.mxu1 %v2378_v7  ;;  %s1837_s28 = sshll.u32 %s2973_s19, 5  ;;  %s1836_s9 = sshll.u32 %s2975_s29, 1  ;;  %v2391_v20 = vld [vmem:[%s2957_s3 + $0xf0] sm:$0xff]   ;;  %v2394_v24 = vld [vmem:[%s2957_s3 + $0xf8] sm:$0xff]   ;;  %v2397_v31 = vld [vmem:[%s2957_s3 + $0x80] sm:$0xff]  }
  0x12   : > { %s2977_s18 = smov (!%p312_p7, %s2471_s18), 3  ;;  %s1846_s14 = sshll.u32 %s2973_s19, 2  ;;  %v2399_v51 = vld [vmem:[%s2957_s3] sm:$0xff]   ;;  %v2400_v54 = vld [vmem:[%s2957_s3 + $0x48] sm:$0xff]   ;;  %v2403_v0 = vld [vmem:[%s2957_s3 + $0x50] sm:$0xff]  }
  0x13   : > { %s2603_s15 = sadd.s32 %s1846_s14, %s2977_s18  ;;  %s2608_s17 = sadd.s32 %s1837_s28, %s1836_s9  ;;  %v2401_v57 = vld [vmem:[%s2957_s3 + $0x88] sm:$0xff]   ;;  %v2404_v2 = vld [vmem:[%s2957_s3 + $0x90] sm:$0xff]  }
  0x14   : > { %2068 = vmatpush3.bf16.msra.mxu0 %v2379_v8  ;;  %2224 = vmatpush3.bf16.msra.mxu1 %v2378_v7  ;;  %s1838_s6 = sshll.u32 %s2608_s17, 2  ;;  %s1833_s12 = sshll.u32 %s2973_s19, 3  ;;  %v2402_v62 = vld [vmem:[%s2957_s3 + $0x8] sm:$0xff]   ;;  %v2405_v6 = vld [vmem:[%s2957_s3 + $0x10] sm:$0xff]   ;;  %v2407_v8 = vld [vmem:[%s2957_s3 + $0x98] sm:$0xff]  }
  0x15   : > { %2069 = vmatprep.subr.bf16.mxu0 %v2380_v9  ;;  %2225 = vmatprep.subr.bf16.mxu1 %v2381_v10  ;;  %s2631_s14 = scalar_lea.vmem %s2955_s1, %s1838_s6  ;;  %s1832_s30 = sshll.u32 %s2977_s18, 1  ;;  %v2406_v9 = vld [vmem:[%s2957_s3 + $0x58] sm:$0xff]   ;;  %v2444_v27 = vld [vmem:[%s2957_s3 + $0x1b0] sm:$0xff]  }
  0x16   : > { %v2395_v21 = vld [vmem:[%s2631_s14] sm:$0xff]   ;;  %v2398_v30 = vld [vmem:[%s2631_s14 + $0x8] sm:$0xff]   ;;  %v2409_v1 = vld [vmem:[%s2631_s14 + $0x10] sm:$0xff]   ;;  %s2715_s11 = sadd.s32 %s1833_s12, %s1832_s30  ;;  %s2926_s8 = scalar_lea.vmem %s2958_s4, %s1838_s6 }
  0x17   : > { %v409_v25 = vshrl.u32 %v2395_v21, 16  ;;  %v412_v26 = vshll.u32 %v2395_v21, 16  ;;  %v416_v34 = vshrl.u32 %v2398_v30, 16  ;;  %v419_v35 = vshll.u32 %v2398_v30, 16  ;;  %s1834_s26 = sshll.u32 %s2715_s11, 2  ;;  %v2414_v30 = vld [vmem:[%s2957_s3 + $0xa8] sm:$0xff]  }
  0x18   : > { %2070 = vmatpush3.bf16.msra.mxu0 %v2382_v11  ;;  %2226 = vmatpush3.bf16.msra.mxu1 %v2381_v10  ;;  %v423_v4 = vshrl.u32 %v2409_v1, 16  ;;  %v426_v5 = vshll.u32 %v2409_v1, 16  ;;  %s318_s10 = scalar_lea.vmem %s2954_s0, %s1834_s26  ;;  %s1847_s17 = sshll.u32 %s2603_s15, 1 }
  0x19   : > { %2071 = vmatprep.subr.bf16.mxu0 %v2383_v12  ;;  %2227 = vmatprep.subr.bf16.mxu1 %v2384_v13  ;;  %v411_v29 = vrot.slane %v409_v25, 7  ;;  %v418_v39 = vrot.slane %v416_v34, 7  ;;  %v2408_v12 = vld [vmem:[%s2957_s3 + $0x18] sm:$0xff]   ;;  %s357_s28 = scalar_lea.vmem %s2959_s5, %s1847_s17 }
  0x1a   : > { %v425_v7 = vrot.slane %v423_v4, 7 }
  0x1b   : > { %v414_v32 = vor.u32 %v412_v26, %v411_v29  ;;  %v465_v33 = vsel %vm2647_vm2, %v411_v29, 0  ;;  %v421_v44 = vor.u32 %v419_v35, %v418_v39  ;;  %v466_v45 = vsel %vm2647_vm2, %v418_v39, 0  ;;  %v2413_v35 = vld [vmem:[%s2957_s3 + $0x68] sm:$0xff]   ;;  %v2423_v39 = vld [vmem:[%s318_s10] sm:$0xff]   ;;  %s338_s10 = scalar_lea.vmem %s2956_s2, %s1834_s26 }
  0x1c   : > { %2072 = vmatpush3.bf16.msra.mxu0 %v2385_v14  ;;  %2228 = vmatpush3.bf16.msra.mxu1 %v2384_v13  ;;  %v491_v36 = vshll.u32 %v465_v33, 16  ;;  %v566_v37 = vrot.slane %v465_v33, 1  ;;  %v569_v48 = vrot.slane %v466_v45, 1  ;;  %v503_v49 = vshll.u32 %v466_v45, 16  ;;  %v2418_v45 = vld [vmem:[%s2957_s3 + $0xb0] sm:$0xff]  }
  0x1d   : > { %2073 = vmatprep.subr.bf16.mxu0 %v2386_v15  ;;  %2229 = vmatprep.subr.bf16.mxu1 %v2387_v16  ;;  %v2662_v38 = vsel %vm2647_vm2, 0, %v414_v32  ;;  %v2676_v50 = vsel %vm2647_vm2, 0, %v421_v44  ;;  %v428_v10 = vor.u32 %v426_v5, %v425_v7  ;;  %v467_v11 = vsel %vm2647_vm2, %v425_v7, 0  ;;  %v2410_v15 = vld [vmem:[%s2957_s3 + $0x60] sm:$0xff]   ;;  %v2417_v44 = vld [vmem:[%s2957_s3 + $0x70] sm:$0xff]  }
  0x1e   : > { %v484_v40 = vshrl.u32 %v2662_v38, 16  ;;  %v486_v41 = vshll.u32 %v2662_v38, 16  ;;  %v565_v42 = vrot.slane %v2662_v38, 1  ;;  %v493_v43 = vrot.slane %v491_v36, 1 }
  0x1f   : > { %v568_v53 = vrot.slane %v2676_v50, 1  ;;  %v496_v55 = vshrl.u32 %v2676_v50, 16  ;;  %v498_v56 = vshll.u32 %v2676_v50, 16  ;;  %v505_v61 = vrot.slane %v503_v49, 1 }
  0x20   : > { %2074 = vmatpush3.bf16.msra.mxu0 %v2388_v17  ;;  %2230 = vmatpush3.bf16.msra.mxu1 %v2387_v16  ;;  %v488_v46 = vrot.slane %v486_v41, 1  ;;  %v2670_v47 = vsel %vm561_vm3, %v565_v42, %v566_v37  ;;  %v515_v13 = vshll.u32 %v467_v11, 16  ;;  %v2736_v14 = vsel %vm2647_vm2, 0, %v428_v10  ;;  %v2416_v16 = vld [vmem:[%s2631_s14 + $0x18] sm:$0xff]  }
  0x21   : > { %2075 = vmatprep.subr.bf16.mxu0 %v2389_v18  ;;  %2231 = vmatprep.subr.bf16.mxu1 %v2390_v19  ;;  %v2695_v59 = vsel %vm561_vm3, %v568_v53, %v569_v48  ;;  %v500_v60 = vrot.slane %v498_v56, 1  ;;  %v572_v17 = vrot.slane %v467_v11, 1  ;;  %v508_v18 = vshrl.u32 %v2736_v14, 16  ;;  %v2421_v56 = vld [vmem:[%s2957_s3 + $0xb8] sm:$0xff]  }
  0x22   : > { %2235 = vmatprep.mubr.bf16.mxu1 %v2670_v47  ;;  %v489_v52 = vor.u32 %v488_v46, %v484_v40  ;;  %v571_v21 = vrot.slane %v2736_v14, 1  ;;  %v517_v25 = vrot.slane %v515_v13, 1  ;;  %v2415_v40 = vld [vmem:[%s2957_s3 + $0x28] sm:$0xff]   ;;  %v402_v48 = vshrl.u32 %v2423_v39, 16 }
  0x23   : > { %v501_v63 = vor.u32 %v500_v60, %v496_v55  ;;  %v405_v49 = vshll.u32 %v2423_v39, 16 }
  0x24   : > { %2076 = vmatpush3.bf16.msra.mxu0 %v2391_v20  ;;  %2232 = vmatpush3.bf16.msra.mxu1 %v2390_v19  ;;  %v2692_v58 = vsel %vm470_vm4, %v489_v52, %v493_v43  ;;  %v510_v19 = vshll.u32 %v2736_v14, 16  ;;  %v2411_v20 = vld [vmem:[%s2957_s3 + $0xa0] sm:$0xff]   ;;  %v2749_v26 = vsel %vm561_vm3, %v571_v21, %v572_v17  ;;  %v2434_v21 = vld [vmem:[%s2957_s3 + $0x218] sm:$0xff]  }
  0x25   : > { %2077 = vmatprep.subr.bf16.mxu0 %v2392_v22  ;;  %2233 = vmatprep.subr.bf16.mxu1 %v2393_v23  ;;  %v2711_v3 = vsel %vm470_vm4, %v501_v63, %v505_v61  ;;  %v430_v22 = vshrl.u32 %v2416_v16, 16  ;;  %v2420_v63 = vld [vmem:[%s2957_s3 + $0x78] sm:$0xff]  }
  0x26   : > { %859 = vmatprep.mubr.bf16.mxu0 %v2692_v58 }
  0x28   : > { %2078 = vmatpush3.bf16.msra.mxu0 %v2394_v24  ;;  %2234 = vmatpush3.bf16.msra.mxu1 %v2393_v23  ;;  %v433_v23 = vshll.u32 %v2416_v16, 16  ;;  %v512_v24 = vrot.slane %v510_v19, 1  ;;  %v2426_v16 = vld [vmem:[%s2957_s3 + $0x180] sm:$0xff]   ;;  %v2431_v19 = vld [vmem:[%s2957_s3 + $0x210] sm:$0xff]  }
  0x29   : > { %2115 = vmatprep.subr.bf16.mxu0 %v2396_v28  ;;  %2243 = vmatprep.subr.bf16.mxu1 %v2397_v31  ;;  %v432_v28 = vrot.slane %v430_v22, 7  ;;  %v2432_v22 = vld [vmem:[%s2957_s3 + $0x190] sm:$0xff]  }
  0x2a   : > { %v513_v29 = vor.u32 %v512_v24, %v508_v18  ;;  %v2427_v18 = vld [vmem:[%s2957_s3 + $0x1c8] sm:$0xff]   ;;  %v2437_v24 = vld [vmem:[%s2957_s3 + $0x220] sm:$0xff]  }
  0x2b   : > { %2236 = vmatmul.mubr.bf16.vlgmr.msra.gmra.mrb[0].mxu1 %v2695_v59  ;;  %860 = vmatmul.mubr.bf16.vlgmr.msra.gmra.mrb[0].mxu0 %v2662_v38  ;;  %v435_v32 = vor.u32 %v433_v23, %v432_v28  ;;  %v468_v33 = vsel %vm2647_vm2, %v432_v28, 0  ;;  %v2435_v23 = vld [vmem:[%s2957_s3 + $0x198] sm:$0xff]   ;;  %v2436_v28 = vld [vmem:[%s2957_s3 + $0x1e0] sm:$0xff]  }
  0x2c   : > { %2244 = vmatpush3.bf16.msra.mxu1 %v2397_v31  ;;  %2116 = vmatpush3.bf16.msra.mxu0 %v2399_v51  ;;  %v2412_v31 = vld [vmem:[%s2957_s3 + $0x20] sm:$0xff]   ;;  %v2766_v34 = vsel %vm470_vm4, %v513_v29, %v517_v25  ;;  %v527_v36 = vshll.u32 %v468_v33, 16  ;;  %v575_v37 = vrot.slane %v468_v33, 1 }
  0x2d   : > { %2245 = vmatprep.subr.bf16.mxu1 %v2401_v57  ;;  %2117 = vmatprep.subr.bf16.mxu0 %v2400_v54  ;;  %v2777_v41 = vsel %vm2647_vm2, 0, %v435_v32  ;;  %v404_v54 = vrot.slane %v402_v48, 7  ;;  %v2448_v25 = vld [vmem:[%s338_s10] sm:$0xff]   ;;  %v2439_v32 = vld [vmem:[%s2957_s3 + $0x1e8] sm:$0xff]   ;;  %v2446_v48 = vld [vmem:[%s2957_s3 + $0x238] sm:$0xff]  }
  0x2e   : > { %867 = vmatprep.mubr.bf16.mxu0 %v2711_v3  ;;  %2239 = vmatprep.mubr.bf16.mxu1 %v2749_v26  ;;  %v520_v42 = vshrl.u32 %v2777_v41, 16  ;;  %v522_v43 = vshll.u32 %v2777_v41, 16  ;;  %v574_v46 = vrot.slane %v2777_v41, 1  ;;  %v529_v52 = vrot.slane %v527_v36, 1  ;;  %v2443_v36 = vld [vmem:[%s2957_s3 + $0x230] sm:$0xff]  }
  0x2f   : > { %v407_v60 = vor.u32 %v405_v49, %v404_v54  ;;  %v464_v61 = vsel %vm2647_vm2, %v404_v54, 0  ;;  %v437_v29 = vshrl.u32 %v2448_v25, 16  ;;  %v2445_v54 = vld [vmem:[%s2957_s3 + $0x1f8] sm:$0xff]  }
  0x30   : > { %2246 = vmatpush3.bf16.msra.mxu1 %v2401_v57  ;;  %2118 = vmatpush3.bf16.msra.mxu0 %v2402_v62  ;;  %v524_v51 = vrot.slane %v522_v43, 1  ;;  %v2790_v53 = vsel %vm561_vm3, %v574_v46, %v575_v37  ;;  %v2419_v57 = vld [vmem:[%s2957_s3 + $0x30] sm:$0xff]   ;;  %v563_v1 = vrot.slane %v464_v61, 1 }
  0x31   : > { %2247 = vmatprep.subr.bf16.mxu1 %v2404_v2  ;;  %2119 = vmatprep.subr.bf16.mxu0 %v2403_v0  ;;  %v479_v0 = vshll.u32 %v464_v61, 16  ;;  %v458_v4 = vsel %vm2647_vm2, 0, %v407_v60  ;;  %v2442_v43 = vld [vmem:[%s2957_s3 + $0x1f0] sm:$0xff]  }
  0x32   : > { %v525_v55 = vor.u32 %v524_v51, %v520_v42  ;;  %v472_v5 = vshrl.u32 %v458_v4, 16  ;;  %v562_v7 = vrot.slane %v458_v4, 1 }
  0x33   : > { %868 = vmatmul.mubr.bf16.gmra.mrb[4].mxu0 %v2676_v50  ;;  %2240 = vmatmul.mubr.bf16.gmra.mrb[4].mxu1 %v2790_v53  ;;  %v481_v11 = vrot.slane %v479_v0, 1 }
  0x34   : > { %2248 = vmatpush3.bf16.msra.mxu1 %v2404_v2  ;;  %2120 = vmatpush3.bf16.msra.mxu0 %v2405_v6  ;;  %v2802_v62 = vsel %vm470_vm4, %v525_v55, %v529_v52  ;;  %v2422_v2 = vld [vmem:[%s2957_s3 + $0x38] sm:$0xff]   ;;  %v474_v6 = vshll.u32 %v458_v4, 16 }
  0x35   : > { %2249 = vmatprep.subr.bf16.mxu1 %v2407_v8  ;;  %2121 = vmatprep.subr.bf16.mxu0 %v2406_v9  ;;  %v2424_v9 = vld [vmem:[%s2957_s3 + $0x1c0] sm:$0xff]  }
  0x36   : > { %875 = vmatprep.mubr.bf16.mxu0 %v2766_v34  ;;  %v476_v10 = vrot.slane %v474_v6, 1 }
  0x38   : > { %2250 = vmatpush3.bf16.msra.mxu1 %v2407_v8  ;;  %2122 = vmatpush3.bf16.msra.mxu0 %v2408_v12  ;;  %v2425_v8 = vld [vmem:[%s2957_s3 + $0x200] sm:$0xff]   ;;  %v564_v12 = vsel %vm561_vm3, %v562_v7, %v563_v1  ;;  %v477_v13 = vor.u32 %v476_v10, %v472_v5 }
  0x39   : > { %2251 = vmatprep.subr.bf16.mxu1 %v2411_v20  ;;  %2123 = vmatprep.subr.bf16.mxu0 %v2410_v15  ;;  %v2428_v15 = vld [vmem:[%s2957_s3 + $0x208] sm:$0xff]  }
  0x3a   : > { %2259 = vmatprep.mubr.bf16.mxu1 %v564_v12  ;;  %v482_v17 = vsel %vm470_vm4, %v477_v13, %v481_v11 }
  0x3b   : > { %876 = vmatmul.mubr.bf16.gmra.mrb[8].mxu0 %v2736_v14 }
  0x3c   : > { %2252 = vmatpush3.bf16.msra.mxu1 %v2411_v20  ;;  %2124 = vmatpush3.bf16.msra.mxu0 %v2412_v31  ;;  %v2429_v20 = vld [vmem:[%s2957_s3 + $0x188] sm:$0xff]   ;;  %v439_v31 = vrot.slane %v437_v29, 7 }
  0x3d   : > { %2253 = vmatprep.subr.bf16.mxu1 %v2414_v30  ;;  %2125 = vmatprep.subr.bf16.mxu0 %v2413_v35 }
  0x3e   : > { %883 = vmatprep.mubr.bf16.mxu0 %v2802_v62  ;;  %v469_v35 = vsel %vm2647_vm2, %v439_v31, 0 }
  0x3f   : > { %v578_v37 = vrot.slane %v469_v35, 1  ;;  %v539_v39 = vshll.u32 %v469_v35, 16 }
  0x40   : > { %2254 = vmatpush3.bf16.msra.mxu1 %v2414_v30  ;;  %2126 = vmatpush3.bf16.msra.mxu0 %v2415_v40  ;;  %v440_v30 = vshll.u32 %v2448_v25, 16  ;;  %v2441_v40 = vld [vmem:[%s2957_s3 + $0x1a8] sm:$0xff]  }
  0x41   : > { %2255 = vmatprep.subr.bf16.mxu1 %v2418_v45  ;;  %2127 = vmatprep.subr.bf16.mxu0 %v2417_v44  ;;  %v541_v52 = vrot.slane %v539_v39, 1 }
  0x42   : > { %v442_v33 = vor.u32 %v440_v30, %v439_v31 }
  0x43   : > { %884 = vmatmul.mubr.bf16.gmra.mrb[12].mxu0 %v2777_v41 }
  0x44   : > { %2256 = vmatpush3.bf16.msra.mxu1 %v2418_v45  ;;  %2128 = vmatpush3.bf16.msra.mxu0 %v2419_v57  ;;  %v463_v42 = vsel %vm2647_vm2, 0, %v442_v33  ;;  %v2447_v57 = vld [vmem:[%s2957_s3 + $0x1b8] sm:$0xff]  }
  0x45   : > { %2257 = vmatprep.subr.bf16.mxu1 %v2421_v56  ;;  %2129 = vmatprep.subr.bf16.mxu0 %v2420_v63  ;;  %v577_v44 = vrot.slane %v463_v42, 1  ;;  %v532_v45 = vshrl.u32 %v463_v42, 16  ;;  %v534_v46 = vshll.u32 %v463_v42, 16 }
  0x46   : > { %1133 = vmatprep.mubr.bf16.mxu0 %v482_v17 }
  0x47   : > { %v579_v49 = vsel %vm561_vm3, %v577_v44, %v578_v37  ;;  %v536_v51 = vrot.slane %v534_v46, 1 }
  0x48   : > { %2258 = vmatpush3.bf16.msra.mxu1 %v2421_v56  ;;  %2130 = vmatpush3.bf16.msra.mxu0 %v2422_v2 }
  0x49   : > { %2267 = vmatprep.subr.bf16.mxu1 %v2425_v8  ;;  %2167 = vmatprep.subr.bf16.mxu0 %v2424_v9  ;;  %v537_v55 = vor.u32 %v536_v51, %v532_v45 }
  0x4b   : > { %2260 = vmatmul.mubr.bf16.vlgmr.msra.gmra.mrb[0].mxu1 %v2670_v47  ;;  %1134 = vmatmul.mubr.bf16.vlgmr.msra.gmra.mrb[16].mxu0 %v458_v4  ;;  %v2430_v47 = vld [vmem:[%s2957_s3 + $0x1d0] sm:$0xff]   ;;  %v542_v56 = vsel %vm470_vm4, %v537_v55, %v541_v52 }
  0x4c   : > { %2268 = vmatpush3.bf16.msra.mxu1 %v2425_v8  ;;  %2168 = vmatpush3.bf16.msra.mxu0 %v2426_v16 }
  0x4d   : > { %2269 = vmatprep.subr.bf16.mxu1 %v2428_v15  ;;  %1141 = vmatprep.mubr.bf16.mxu0 %v2692_v58  ;;  %v2433_v58 = vld [vmem:[%s2957_s3 + $0x1d8] sm:$0xff]  }
  0x4e   : > { %2169 = vmatprep.subr.bf16.mxu0 %v2427_v18  ;;  %2263 = vmatprep.mubr.bf16.mxu1 %v2695_v59 }
  0x50   : > { %2270 = vmatpush3.bf16.msra.mxu1 %v2428_v15  ;;  %2170 = vmatpush3.bf16.msra.mxu0 %v2429_v20 }
  0x51   : > { %2271 = vmatprep.subr.bf16.mxu1 %v2431_v19  ;;  %2171 = vmatprep.subr.bf16.mxu0 %v2430_v47 }
  0x53   : > { %2264 = vmatmul.mubr.bf16.gmra.mrb[4].mxu1 %v2749_v26  ;;  %1142 = vmatmul.mubr.bf16.gmra.mrb[20].mxu0 %v2662_v38  ;;  %v2440_v38 = vld [vmem:[%s2957_s3 + $0x228] sm:$0xff]  }
  0x54   : > { %2272 = vmatpush3.bf16.msra.mxu1 %v2431_v19  ;;  %2283 = vmatprep.mubr.bf16.mxu1 %v2695_v59  ;;  %v2438_v59 = vld [vmem:[%s2957_s3 + $0x1a0] sm:$0xff]  }
  0x55   : > { %2273 = vmatprep.subr.bf16.mxu1 %v2434_v21  ;;  %2172 = vmatpush3.bf16.msra.mxu0 %v2432_v22 }
  0x56   : > { %1149 = vmatprep.mubr.bf16.mxu0 %v2711_v3  ;;  %2173 = vmatprep.subr.bf16.mxu0 %v2433_v58 }
  0x58   : > { %2274 = vmatpush3.bf16.msra.mxu1 %v2434_v21 }
  0x59   : > { %2275 = vmatprep.subr.bf16.mxu1 %v2437_v24  ;;  %2174 = vmatpush3.bf16.msra.mxu0 %v2435_v23 }
  0x5a   : > { %2175 = vmatprep.subr.bf16.mxu0 %v2436_v28 }
  0x5b   : > { %1150 = vmatmul.mubr.bf16.gmra.mrb[24].mxu0 %v2676_v50 }
  0x5c   : > { %2276 = vmatpush3.bf16.msra.mxu1 %v2437_v24  ;;  %1157 = vmatprep.mubr.bf16.mxu0 %v2766_v34 }
  0x5d   : > { %2277 = vmatprep.subr.bf16.mxu1 %v2440_v38  ;;  %2176 = vmatpush3.bf16.msra.mxu0 %v2438_v59 }
  0x5e   : > { %2177 = vmatprep.subr.bf16.mxu0 %v2439_v32 }
  0x60   : > { %2278 = vmatpush3.bf16.msra.mxu1 %v2440_v38 }
  0x61   : > { %2279 = vmatprep.subr.bf16.mxu1 %v2443_v36  ;;  %2178 = vmatpush3.bf16.msra.mxu0 %v2441_v40 }
  0x62   : > { %2179 = vmatprep.subr.bf16.mxu0 %v2442_v43 }
  0x63   : > { %1158 = vmatmul.mubr.bf16.gmra.mrb[28].mxu0 %v2736_v14 }
  0x64   : > { %2280 = vmatpush3.bf16.msra.mxu1 %v2443_v36  ;;  %1456 = vmatprep.mubr.bf16.mxu0 %v2711_v3 }
  0x65   : > { %2281 = vmatprep.subr.bf16.mxu1 %v2446_v48  ;;  %2180 = vmatpush3.bf16.msra.mxu0 %v2444_v27 }
  0x66   : > { %2181 = vmatprep.subr.bf16.mxu0 %v2445_v54 }
  0x68   : > { %2282 = vmatpush3.bf16.msra.mxu1 %v2446_v48 }
  0x69   : > { %2182 = vmatpush3.bf16.msra.mxu0 %v2447_v57 }
  0x6b   : > { %2284 = vmatmul.mubr.bf16.vlgmr.msra.gmra.mrb[0].mxu1 %v2749_v26 }
  0x6c   : > { %2287 = vmatprep.mubr.bf16.mxu1 %v2790_v53  ;;  %1457 = vmatmul.mubr.bf16.vlgmr.msra.gmra.mrb[32].mxu0 %v2676_v50 }
  0x6d   : > { %1464 = vmatprep.mubr.bf16.mxu0 %v2766_v34 }
  0x73   : > { %2288 = vmatmul.mubr.bf16.gmra.mrb[4].mxu1 %v579_v49 }
  0x74   : > { %1465 = vmatmul.mubr.bf16.gmra.mrb[36].mxu0 %v2736_v14 }
  0x75   : > { %1472 = vmatprep.mubr.bf16.mxu0 %v2802_v62 }
  0x7c   : > { %1473 = vmatmul.mubr.bf16.gmra.mrb[40].mxu0 %v2777_v41 }
  0x7d   : > { %1480 = vmatprep.mubr.bf16.mxu0 %v542_v56 }
  0x84   : > { %1481 = vmatmul.mubr.bf16.gmra.mrb[44].mxu0 %v463_v42 }
  0xfe   : > { %v2079_v3 = vpop.f32.mrb[0].mxu0 }
  0xff   : > { %v2080_v60 = vpop.f32.mrb[1].mxu0 }
 0x100   : > { %v2081_v61 = vadd.f32 %v2080_v60, %v2079_v3  ;;  %v2082_v63 = vpop.f32.mrb[2].mxu0 }
 0x101   : > { %v2083_v26 = vpop.f32.mrb[3].mxu0 }
 0x102   : > { %v2084_v0 = vadd.f32 %v2083_v26, %v2082_v63 }
 0x106   : > { %v2085_v53 = vpop.f32.mrb[4].mxu0 }
 0x107   : > { %v2086_v1 = vpop.f32.mrb[5].mxu0 }
 0x108   : > { %v2087_v50 = vadd.f32 %v2086_v1, %v2085_v53  ;;  %v2088_v2 = vpop.f32.mrb[6].mxu0 }
 0x109   : > { %v2089_v34 = vpop.f32.mrb[7].mxu0 }
 0x10a   : > { %v2090_v4 = vadd.f32 %v2089_v34, %v2088_v2 }
 0x10e   : > { %v2091_v5 = vpop.f32.mrb[8].mxu0 }
 0x10f   : > { %v2092_v14 = vpop.f32.mrb[9].mxu0 }
 0x110   : > { %v2093_v6 = vadd.f32 %v2092_v14, %v2091_v5  ;;  %v2094_v62 = vpop.f32.mrb[10].mxu0 }
 0x111   : > { %v2095_v7 = vpop.f32.mrb[11].mxu0 }
 0x112   : > { %v2096_v41 = vadd.f32 %v2095_v7, %v2094_v62 }
 0x116   : > { %v2097_v8 = vpop.f32.mrb[12].mxu0 }
 0x117   : > { %v2098_v9 = vpop.f32.mrb[13].mxu0 }
 0x118   : > { %v2099_v10 = vadd.f32 %v2098_v9, %v2097_v8  ;;  %v2100_v11 = vpop.f32.mrb[14].mxu0 }
 0x119   : > { %v2101_v12 = vpop.f32.mrb[15].mxu0 }
 0x11a   : > { %v2102_v13 = vadd.f32 %v2101_v12, %v2100_v11 }
 0x11e   : > { %v2131_v15 = vpop.f32.mrb[16].mxu0 }
 0x11f   : > { %v2132_v16 = vpop.f32.mrb[17].mxu0 }
 0x120   : > { %v2133_v17 = vadd.f32 %v2132_v16, %v2131_v15  ;;  %v2134_v18 = vpop.f32.mrb[18].mxu0 }
 0x121   : > { %v2135_v19 = vpop.f32.mrb[19].mxu0 }
 0x122   : > { %v2294_v20 = vadd.f32 %v2133_v17, %v2081_v61  ;;  %v2136_v47 = vadd.f32 %v2135_v19, %v2134_v18 }
 0x124   : > { %v2300_v21 = vadd.f32 %v2136_v47, %v2084_v0 }
 0x126   : > { %v2137_v22 = vpop.f32.mrb[20].mxu0 }
 0x127   : > { %v2138_v58 = vpop.f32.mrb[21].mxu0 }
 0x128   : > { %v2139_v23 = vadd.f32 %v2138_v58, %v2137_v22  ;;  %v2140_v24 = vpop.f32.mrb[22].mxu0 }
 0x129   : > { %v2141_v25 = vpop.f32.mrb[23].mxu0 }
 0x12a   : > { %v2291_v28 = vadd.f32 %v2139_v23, %v2087_v50  ;;  %v2142_v29 = vadd.f32 %v2141_v25, %v2140_v24 }
 0x12c   : > { %v2297_v30 = vadd.f32 %v2142_v29, %v2090_v4 }
 0x12e   : > { %v2143_v38 = vpop.f32.mrb[24].mxu0 }
 0x12f   : > { %v2144_v59 = vpop.f32.mrb[25].mxu0 }
 0x130   : > { %v2145_v31 = vadd.f32 %v2144_v59, %v2143_v38  ;;  %v2146_v32 = vpop.f32.mrb[26].mxu0 }
 0x131   : > { %v2147_v33 = vpop.f32.mrb[27].mxu0 }
 0x132   : > { %v2306_v35 = vadd.f32 %v2145_v31, %v2093_v6  ;;  %v2148_v36 = vadd.f32 %v2147_v33, %v2146_v32 }
 0x134   : > { %v2312_v37 = vadd.f32 %v2148_v36, %v2096_v41 }
 0x136   : > { %v2149_v39 = vpop.f32.mrb[28].mxu0 }
 0x137   : > { %v2150_v40 = vpop.f32.mrb[29].mxu0 }
 0x138   : > { %v2151_v42 = vadd.f32 %v2150_v40, %v2149_v39  ;;  %v2152_v43 = vpop.f32.mrb[30].mxu0 }
 0x139   : > { %v2153_v44 = vpop.f32.mrb[31].mxu0 }
 0x13a   : > { %v2917_v45 = vadd.f32 %v2151_v42, %v2099_v10  ;;  %v2154_v46 = vadd.f32 %v2153_v44, %v2152_v43 }
 0x13c   : > { %v2919_v48 = vadd.f32 %v2154_v46, %v2102_v13 }
 0x13e   : > { %v2285_v49 = vpop.f32.mrb[0].mxu1 }
 0x13f   : > { %v1523_v51 = vpop.f32.mrb[1].mxu1  ;;  %v2183_v52 = vpop.f32.mrb[32].mxu0 }
 0x140   : > { %v2286_v27 = vpop.f32.mrb[2].mxu1  ;;  %v2184_v54 = vpop.f32.mrb[33].mxu0 }
 0x141   : > { %v1526_v55 = vpop.f32.mrb[3].mxu1  ;;  %v2185_v56 = vadd.f32 %v2184_v54, %v2183_v52  ;;  %v2186_v57 = vpop.f32.mrb[34].mxu0 }
 0x142   : > { %v2187_v3 = vpop.f32.mrb[35].mxu0 }
 0x143   : > { %v2295_v60 = vadd.f32 %v2294_v20, %v2185_v56  ;;  %v2188_v61 = vadd.f32 %v2187_v3, %v2186_v57 }
 0x145   : > { %v2296_v63 = vadd.f32 %v2295_v60, %v1523_v51  ;;  %v2301_v26 = vadd.f32 %v2300_v21, %v2188_v61 }
 0x146   : > { %v2289_v0 = vpop.f32.mrb[4].mxu1 }
 0x147   : > { %v1539_v53 = vpop.f32.mrb[5].mxu1  ;;  %v2302_v1 = vadd.f32 %v2301_v26, %v1526_v55  ;;  %v2189_v50 = vpop.f32.mrb[36].mxu0  ;;  %v1615_v34 = vmul.f32 %v2296_v63, %v2296_v63 }
 0x148   : > { %v2290_v2 = vpop.f32.mrb[6].mxu1  ;;  %v2190_v4 = vpop.f32.mrb[37].mxu0 }
 0x149   : > { %v1542_v5 = vpop.f32.mrb[7].mxu1  ;;  %v2043_v14 = vpack.c.bf16 %v2302_v1, %v2296_v63  ;;  %v1602_v6 = vadd.f32 %v2302_v1, %v2296_v63  ;;  %v1616_v62 = vmul.f32 %v2302_v1, %v2302_v1  ;;  %v2191_v7 = vadd.f32 %v2190_v4, %v2189_v50  ;;  %v2192_v41 = vpop.f32.mrb[38].mxu0 }
 0x14a   : > { %v2193_v8 = vpop.f32.mrb[39].mxu0 }
 0x14b   : > { %2044 = vst [vmem:[%s2926_s8] sm:$0xff] %v2043_v14   ;;  %v1623_v9 = vadd.f32 %v1616_v62, %v1615_v34  ;;  %v2292_v10 = vadd.f32 %v2291_v28, %v2191_v7  ;;  %v2194_v11 = vadd.f32 %v2193_v8, %v2192_v41 }
 0x14d   : > { %v2293_v12 = vadd.f32 %v2292_v10, %v2285_v49  ;;  %v2298_v13 = vadd.f32 %v2297_v30, %v2194_v11 }
 0x14f   : > { %v1603_v15 = vadd.f32 %v2293_v12, %v1602_v6  ;;  %v1617_v16 = vmul.f32 %v2293_v12, %v2293_v12  ;;  %v2299_v17 = vadd.f32 %v2298_v13, %v2286_v27  ;;  %v2195_v18 = vpop.f32.mrb[40].mxu0 }
 0x150   : > { %v2196_v19 = vpop.f32.mrb[41].mxu0 }
 0x151   : > { %v1624_v20 = vadd.f32 %v1623_v9, %v1617_v16  ;;  %v2048_v47 = vpack.c.bf16 %v2299_v17, %v2293_v12  ;;  %v1604_v21 = vadd.f32 %v2299_v17, %v1603_v15  ;;  %v1618_v22 = vmul.f32 %v2299_v17, %v2299_v17  ;;  %v2198_v58 = vpop.f32.mrb[42].mxu0 }
 0x152   : > { %v2197_v23 = vadd.f32 %v2196_v19, %v2195_v18  ;;  %v2199_v24 = vpop.f32.mrb[43].mxu0 }
 0x153   : > { %2060 = vst [vmem:[%s2926_s8 + $0x8] sm:$0xff] %v2048_v47   ;;  %v1625_v25 = vadd.f32 %v1624_v20, %v1618_v22  ;;  %v2200_v29 = vadd.f32 %v2199_v24, %v2198_v58 }
 0x154   : > { %v2307_v28 = vadd.f32 %v2306_v35, %v2197_v23 }
 0x155   : > { %v2313_v38 = vadd.f32 %v2312_v37, %v2200_v29 }
 0x156   : > { %v2308_v59 = vadd.f32 %v2307_v28, %v1539_v53 }
 0x157   : > { %v2314_v30 = vadd.f32 %v2313_v38, %v1542_v5  ;;  %v2201_v31 = vpop.f32.mrb[44].mxu0 }
 0x158   : > { %v1605_v32 = vadd.f32 %v2308_v59, %v1604_v21  ;;  %v1619_v33 = vmul.f32 %v2308_v59, %v2308_v59  ;;  %v2202_v36 = vpop.f32.mrb[45].mxu0 }
 0x159   : > { %v2053_v39 = vpack.c.bf16 %v2314_v30, %v2308_v59  ;;  %v1620_v40 = vmul.f32 %v2314_v30, %v2314_v30  ;;  %v2203_v42 = vadd.f32 %v2202_v36, %v2201_v31  ;;  %v2204_v43 = vpop.f32.mrb[46].mxu0 }
 0x15a   : > { %v1626_v44 = vadd.f32 %v1625_v25, %v1619_v33  ;;  %v1606_v46 = vadd.f32 %v2314_v30, %v1605_v32  ;;  %v2205_v49 = vpop.f32.mrb[47].mxu0 }
 0x15b   : > { %2061 = vst [vmem:[%s2926_s8 + $0x10] sm:$0xff] %v2053_v39   ;;  %v2304_v51 = vadd.f32 %v2917_v45, %v2203_v42  ;;  %v2206_v52 = vadd.f32 %v2205_v49, %v2204_v43 }
 0x15c   : > { %v1627_v35 = vadd.f32 %v1626_v44, %v1620_v40 }
 0x15d   : > { %v2305_v37 = vadd.f32 %v2304_v51, %v2289_v0  ;;  %v2310_v27 = vadd.f32 %v2919_v48, %v2206_v52 }
 0x15f   : > { %v1607_v54 = vadd.f32 %v2305_v37, %v1606_v46  ;;  %v1621_v55 = vmul.f32 %v2305_v37, %v2305_v37  ;;  %v2311_v56 = vadd.f32 %v2310_v27, %v2290_v2 }
 0x161   : > { %v1628_v57 = vadd.f32 %v1627_v35, %v1621_v55  ;;  %v2058_v3 = vpack.c.bf16 %v2311_v56, %v2305_v37  ;;  %v1608_v60 = vadd.f32 %v2311_v56, %v1607_v54  ;;  %v1622_v61 = vmul.f32 %v2311_v56, %v2311_v56 }
 0x163   : > { %2062 = vst [vmem:[%s2926_s8 + $0x18] sm:$0xff] %v2058_v3   ;;  %v1609_v63 = vrot.slane %v1608_v60, 4  ;;  %v1629_v26 = vadd.f32 %v1628_v57, %v1622_v61 }
 0x165   : > { %v1610_v53 = vadd.f32 %v1609_v63, %v1608_v60  ;;  %v1630_v1 = vrot.slane %v1629_v26, 4 }
 0x167   : > { %v1611_v50 = vrot.slane %v1610_v53, 2  ;;  %v1631_v45 = vadd.f32 %v1630_v1, %v1629_v26 }
 0x169   : > { %v1612_v34 = vadd.f32 %v1611_v50, %v1610_v53  ;;  %v1632_v4 = vrot.slane %v1631_v45, 2 }
 0x16b   : > { %v1613_v0 = vrot.slane %v1612_v34, 1  ;;  %v1633_v5 = vadd.f32 %v1632_v4, %v1631_v45 }
 0x16d   : > { %v1634_v48 = vrot.slane %v1633_v5, 1  ;;  %v1614_v2 = vadd.f32 %v1613_v0, %v1612_v34 }
 0x16f   : > { %v1635_v14 = vadd.f32 %v1634_v48, %v1633_v5 }
 0x171   : > { %v1637_v6 = vsel %vm455_vm0, %v1614_v2, %v1635_v14 }
 0x172   : > { %1638 = vst [vmem:[%s357_s28] sm:$0x3] %v1637_v6 }
 0x173 PF: > { %s16_s22 = sadd.s32 1, %s2487_s22   ;;  %s2962_s18 = smov %s2479_s20 }
 0x174   : > { %p13_p8 = scmp.ge.s32.totalorder %s16_s22, 10   ;;  %s2963_s19 = smov %s2483_s21 }
 0x175   : > { %s2964_s20 = smov %s2967_s23  ;;  %s2965_s21 = smov %s2971_s24 }
 0x176   :  { %15 = sbr.rel (!%p13_p8) target bundleno = 3 (0x3), region = 86 }

// kernel: pcresblock2_forward.4
= control target key start
LH: loop header
LB: loop body
LE: loop exit
PB: predicated region body
PF: predicated region fallthrough
CT: control target
= control target key end

     0   :  { %s2717_s30 = smov 0   ;;  %s2719_s10 = smov 0   ;;  %s3209_s0 = inlined_call_operand.vmem [shape: bf16[2,4,16,128], index: 0, kind: input, shape index: {}]   ;;  %s3210_s1 = inlined_call_operand.vmem [shape: bf16[2,16,16,128], index: 1, kind: input, shape index: {}]   ;;  %s3211_s2 = inlined_call_operand.vmem [shape: bf16[2,4,16,128], index: 2, kind: input, shape index: {}]   ;;  %s3212_s3 = inlined_call_operand.vmem [shape: f32[1,128], index: 3, kind: input, shape index: {}]   ;;  %s3213_s4 = inlined_call_operand.vmem [shape: f32[1,128], index: 4, kind: input, shape index: {}]   ;;  %s3214_s5 = inlined_call_operand.vmem [shape: f32[1,128], index: 5, kind: input, shape index: {}]   ;;  %s3215_s6 = inlined_call_operand.vmem [shape: f32[1,128], index: 6, kind: input, shape index: {}]   ;;  %s3216_s7 = inlined_call_operand.vmem [shape: bf16[3,384,128], index: 7, kind: input, shape index: {}]   ;;  %s3217_s8 = inlined_call_operand.vmem [shape: bf16[2,16,16,128], index: 8, kind: output, shape index: {0}]   ;;  %s3218_s9 = inlined_call_operand.vmem [shape: f32[2,4,2,128], index: 9, kind: output, shape index: {1}]  }
   0x1   :  { %s2721_s11 = smov 0   ;;  %s2723_s12 = smov 0  }
   0x2   :  { %s2725_s13 = smov 0  }
   0x3 LB: > { %s29_s14 = sadd.s32 1, %s2657_s11  ;;  %s32_s15 = sadd.s32 1, %s2661_s12  ;;  %s2665_s13 = sphi %s2725_s13, %s20_s13   ;;  %s2661_s12 = sphi %s2723_s12, %s3224_s12   ;;  %s2657_s11 = sphi %s2721_s11, %s3223_s11   ;;  %s2653_s10 = sphi %s2719_s10, %s3222_s10   ;;  %s2649_s30 = sphi %s2717_s30, %s3221_s30  }
   0x4   : > { %p30_p0 = scmp.ge.s32.totalorder %s29_s14, 4  ;;  %p1994_p1 = scmp.ge.s32.totalorder %s2665_s13, 1 }
   0x5   : > { %p346_p2 = scmp.lt.s32.totalorder %s2665_s13, 9 }
   0x6   : > { %s3226_s14 = smov (%p30_p0, %s29_s14), 0  ;;  %s3228_s15 = smov (!%p30_p0, %s32_s15), %s2661_s12 }
   0x7   : > { %p347_p3 = pnand %p1994_p1, %p346_p2  ;;  %p34_p4 = scmp.ge.s32.totalorder %s3228_s15, 2 }
   0x8   : > { %v2555_v0 = vld [vmem:[%s3216_s7 + $0x100] sm:$0xff] (!%p347_p3)   ;;  %s1998_s22 = sshll.u32 (!%p347_p3), %s2649_s30, 2  ;;  %v2558_v3 = vld [vmem:[%s3216_s7 + $0x108] sm:$0xff] (!%p347_p3)   ;;  %p418_p5 = scmp.lt.s32.totalorder (!%p347_p3), %s2653_s10, 1  ;;  %v2561_v6 = vld [vmem:[%s3216_s7 + $0x110] sm:$0xff] (!%p347_p3)   ;;  %v485_v14 = vlaneseq (!%p347_p3)  ;;  %vm618_vm0 = vcmask (!%p347_p3), 1040384  }
   0x9   : > { %s3230_s15 = smov (%p34_p4, %s3228_s15), 0  ;;  %350 = sbr.rel (%p347_p3) target bundleno = 374 (0x176), region = 52 }
   0xa   : > { %v2556_v1 = vld [vmem:[%s3216_s7 + $0x140] sm:$0xff] (!%p347_p3)   ;;  %2247 = vmatprep.subr.bf16.mxu0 (!%p347_p3), %v2555_v0  ;;  %v2559_v4 = vld [vmem:[%s3216_s7 + $0x148] sm:$0xff] (!%p347_p3)   ;;  %p430_p6 = scmp.lt.s32.totalorder (!%p347_p3), %s1998_s22, 15  ;;  %v2562_v7 = vld [vmem:[%s3216_s7 + $0x150] sm:$0xff] (!%p347_p3)   ;;  %v486_v18 = vshrl.u32 (!%p347_p3), %v485_v14, 7  ;;  %p420_p7 = scmp.lt.s32.totalorder (!%p347_p3), %s2649_s30, 3 }
   0xb   : > { %v2557_v2 = vld [vmem:[%s3216_s7 + $0xc0] sm:$0xff] (!%p347_p3)   ;;  %2403 = vmatprep.subr.bf16.mxu1 (!%p347_p3), %v2556_v1  ;;  %v2560_v5 = vld [vmem:[%s3216_s7 + $0xc8] sm:$0xff] (!%p347_p3)   ;;  %v2563_v8 = vld [vmem:[%s3216_s7 + $0xd0] sm:$0xff] (!%p347_p3)   ;;  %vm619_vm1 = vsmask.f32 (!%p347_p3), 256  ;;  %vm724_vm2 = vcmask (!%p347_p3), 1046528  }
   0xc   : > { %2248 = vmatpush3.bf16.msra.mxu0 (!%p347_p3), %v2557_v2  ;;  %2404 = vmatpush3.bf16.msra.mxu1 (!%p347_p3), %v2556_v1  ;;  %v2564_v9 = vld [vmem:[%s3216_s7 + $0x118] sm:$0xff] (!%p347_p3)   ;;  %v2567_v12 = vld [vmem:[%s3216_s7 + $0x120] sm:$0xff] (!%p347_p3)   ;;  %v2570_v16 = vld [vmem:[%s3216_s7 + $0x128] sm:$0xff] (!%p347_p3)   ;;  %v487_v23 = vsub.s32 (!%p347_p3), 0, %v486_v18  ;;  %vm633_vm3 = vsmask.f32 (!%p347_p3), 7424 }
   0xd   : > { %2249 = vmatprep.subr.bf16.mxu0 (!%p347_p3), %v2558_v3  ;;  %2405 = vmatprep.subr.bf16.mxu1 (!%p347_p3), %v2559_v4  ;;  %v2565_v10 = vld [vmem:[%s3216_s7 + $0x158] sm:$0xff] (!%p347_p3)   ;;  %v2568_v13 = vld [vmem:[%s3216_s7 + $0x160] sm:$0xff] (!%p347_p3)   ;;  %v2571_v17 = vld [vmem:[%s3216_s7 + $0x168] sm:$0xff] (!%p347_p3)   ;;  %p474_p8 = scmp.gt.s32.totalorder (!%p347_p3), %s2649_s30, 0 }
   0xe   : > { %v2566_v11 = vld [vmem:[%s3216_s7 + $0xd8] sm:$0xff] (!%p347_p3)   ;;  %v2569_v15 = vld [vmem:[%s3216_s7 + $0xe0] sm:$0xff] (!%p347_p3)   ;;  %v2572_v19 = vld [vmem:[%s3216_s7 + $0xe8] sm:$0xff] (!%p347_p3)  }
   0xf   : > { %v2573_v20 = vld [vmem:[%s3216_s7 + $0x130] sm:$0xff] (!%p347_p3)   ;;  %v2576_v24 = vld [vmem:[%s3216_s7 + $0x138] sm:$0xff] (!%p347_p3)   ;;  %v467_v25 = vld [vmem:[%s3213_s4] sm:$0x1] (!%p347_p3) }
  0x10   : > { %2250 = vmatpush3.bf16.msra.mxu0 %v2560_v5  ;;  %2406 = vmatpush3.bf16.msra.mxu1 %v2559_v4  ;;  %s3232_s10 = smov (!%p418_p5, %s2653_s10), 1  ;;  %s3234_s22 = smov (!%p430_p6, %s1998_s22), 15  ;;  %v2574_v21 = vld [vmem:[%s3216_s7 + $0x170] sm:$0xff]   ;;  %v468_v26 = vld [vmem:[%s3214_s5] sm:$0x1]  ;;  %v2577_v27 = vld [vmem:[%s3216_s7 + $0x178] sm:$0xff]  }
  0x11   : > { %2251 = vmatprep.subr.bf16.mxu0 %v2561_v6  ;;  %2407 = vmatprep.subr.bf16.mxu1 %v2562_v7  ;;  %s2000_s16 = sshll.u32 %s3232_s10, 5  ;;  %s1999_s19 = sshll.u32 %s3234_s22, 1  ;;  %v2575_v22 = vld [vmem:[%s3216_s7 + $0xf0] sm:$0xff]   ;;  %v469_v28 = vmul.f32 %v468_v26, %v467_v25  ;;  %v471_v29 = vld [vmem:[%s3212_s3] sm:$0x1]  ;;  %v2578_v31 = vld [vmem:[%s3216_s7 + $0xf8] sm:$0xff]  }
  0x12   : > { %s2805_s25 = sadd.s32 %s2000_s16, %s1999_s19  ;;  %v470_v32 = vld [vmem:[%s3215_s6] sm:$0x1]  ;;  %s1996_s21 = sshll.u32 %s3232_s10, 3  ;;  %vm2886_vm4 = vmand %vm618_vm0, %vm619_vm1 }
  0x13   : > { %s2001_s29 = sshll.u32 %s2805_s25, 2  ;;  %v472_v35 = vmul.f32 %v471_v29, %v469_v28  ;;  %v2852_v36 = vrot.slane %v469_v28, %v487_v23  ;;  %v2579_v37 = vld [vmem:[%s3216_s7 + $0x40] sm:$0xff]   ;;  %v2583_v29 = vld [vmem:[%s3216_s7 + $0x88] sm:$0xff]   ;;  %s2009_s25 = sshll.u32 %s3232_s10, 2 }
  0x14   : > { %2252 = vmatpush3.bf16.msra.mxu0 %v2563_v8  ;;  %2408 = vmatpush3.bf16.msra.mxu1 %v2562_v7  ;;  %s2825_s23 = scalar_lea.vmem %s3210_s1, %s2001_s29  ;;  %v2863_v42 = vld [vmem:[%s3216_s7 + $0x80] sm:$0xff]   ;;  %s3180_s17 = scalar_lea.vmem %s3217_s8, %s2001_s29 }
  0x15   : > { %2253 = vmatprep.subr.bf16.mxu0 %v2564_v9  ;;  %2409 = vmatprep.subr.bf16.mxu1 %v2565_v10  ;;  %v2206_v30 = vld [vmem:[%s2825_s23] sm:$0xff]   ;;  %v2241_v38 = vld [vmem:[%s2825_s23 + $0x8] sm:$0xff]   ;;  %v473_v39 = vsub.f32 %v470_v32, %v472_v35  ;;  %v2242_v58 = vld [vmem:[%s2825_s23 + $0x10] sm:$0xff]   ;;  %s2879_s20 = scalar_select %p420_p7, %s2649_s30, 3 }
  0x16   : > { %v2207_v33 = vunpack.c.l.bf16 %v2206_v30  ;;  %v2208_v34 = vunpack.c.h.bf16 %v2206_v30  ;;  %v2211_v43 = vunpack.c.l.bf16 %v2241_v38  ;;  %v2212_v44 = vunpack.c.h.bf16 %v2241_v38  ;;  %s3052_s22 = scalar_select %p420_p7, 1, 0 }
  0x17   : > { %v2865_v45 = vrot.slane %v473_v39, %v487_v23  ;;  %v2215_v61 = vunpack.c.l.bf16 %v2242_v58  ;;  %v2216_v62 = vunpack.c.h.bf16 %v2242_v58  ;;  %s1995_s24 = sshll.u32 %s2879_s20, 1  ;;  %v2582_v39 = vld [vmem:[%s3216_s7 + $0x48] sm:$0xff]   ;;  %v2585_v58 = vld [vmem:[%s3216_s7 + $0x50] sm:$0xff]   ;;  %s463_s29 = sadd.s32 %s2009_s25, %s2879_s20 }
  0x18   : > { %2254 = vmatpush3.bf16.msra.mxu0 %v2566_v11  ;;  %2410 = vmatpush3.bf16.msra.mxu1 %v2565_v10  ;;  %v534_v40 = vmul.f32 %v2207_v33, %v2852_v36  ;;  %v535_v41 = vmul.f32 %v2208_v34, %v2852_v36  ;;  %v536_v46 = vmul.f32 %v2211_v43, %v2852_v36  ;;  %s2901_s26 = sadd.s32 %s1996_s21, %s1995_s24  ;;  %s479_s30 = scvt.s32.f32 %s3052_s22 }
  0x19   : > { %2255 = vmatprep.subr.bf16.mxu0 %v2567_v12  ;;  %2411 = vmatprep.subr.bf16.mxu1 %v2568_v13  ;;  %v537_v47 = vmul.f32 %v2212_v44, %v2852_v36  ;;  %v538_v2 = vmul.f32 %v2215_v61, %v2852_v36  ;;  %v539_v3 = vmul.f32 %v2216_v62, %v2852_v36  ;;  %s1997_s27 = sshll.u32 %s2901_s26, 2  ;;  %s2010_s26 = sshll.u32 %s463_s29, 1 }
  0x1a   : > { %v542_v48 = vadd.f32 %v534_v40, %v2865_v45  ;;  %v543_v49 = vadd.f32 %v535_v41, %v2865_v45  ;;  %v544_v50 = vadd.f32 %v536_v46, %v2865_v45  ;;  %s426_s24 = scalar_lea.vmem %s3209_s0, %s1997_s27 }
  0x1b   : > { %v545_v51 = vadd.f32 %v537_v47, %v2865_v45  ;;  %v546_v8 = vadd.f32 %v538_v2, %v2865_v45  ;;  %v547_v9 = vadd.f32 %v539_v3, %v2865_v45  ;;  %v2587_v2 = vld [vmem:[%s3216_s7 + $0x10] sm:$0xff]   ;;  %v2588_v3 = vld [vmem:[%s3216_s7 + $0x58] sm:$0xff]  }
  0x1c   : > { %2256 = vmatpush3.bf16.msra.mxu0 %v2569_v15  ;;  %2412 = vmatpush3.bf16.msra.mxu1 %v2568_v13  ;;  %v550_v52 = vmax.f32 %v542_v48, 0.0  ;;  %v551_v53 = vmax.f32 %v543_v49, 0.0  ;;  %v552_v54 = vmax.f32 %v544_v50, 0.0  ;;  %v2586_v49 = vld [vmem:[%s3216_s7 + $0x90] sm:$0xff]  }
  0x1d   : > { %2257 = vmatprep.subr.bf16.mxu0 %v2570_v16  ;;  %2413 = vmatprep.subr.bf16.mxu1 %v2571_v17  ;;  %v553_v55 = vmax.f32 %v545_v51, 0.0  ;;  %v554_v16 = vmax.f32 %v546_v8, 0.0  ;;  %v555_v23 = vmax.f32 %v547_v9, 0.0  ;;  %v2592_v8 = vld [vmem:[%s3216_s7 + $0xa0] sm:$0xff]  }
  0x1e   : > { %v559_v56 = vpack.c.bf16 %v551_v53, %v550_v52  ;;  %v2584_v53 = vld [vmem:[%s3216_s7 + $0x8] sm:$0xff]  }
  0x1f   : > { %v560_v57 = vpack.c.bf16 %v553_v55, %v552_v54 }
  0x20   : > { %2258 = vmatpush3.bf16.msra.mxu0 %v2572_v19  ;;  %2414 = vmatpush3.bf16.msra.mxu1 %v2571_v17  ;;  %v572_v59 = vshrl.u32 %v559_v56, 16  ;;  %v575_v60 = vshll.u32 %v559_v56, 16 }
  0x21   : > { %2259 = vmatprep.subr.bf16.mxu0 %v2573_v20  ;;  %2415 = vmatprep.subr.bf16.mxu1 %v2574_v21  ;;  %v579_v63 = vshrl.u32 %v560_v57, 16  ;;  %v582_v0 = vshll.u32 %v560_v57, 16 }
  0x22   : > { %v574_v1 = vrot.slane %v572_v59, 7  ;;  %v2589_v59 = vld [vmem:[%s3216_s7 + $0x98] sm:$0xff]  }
  0x23   : > { %v581_v5 = vrot.slane %v579_v63, 7 }
  0x24   : > { %2260 = vmatpush3.bf16.msra.mxu0 %v2575_v22  ;;  %2416 = vmatpush3.bf16.msra.mxu1 %v2574_v21  ;;  %v577_v6 = vor.u32 %v575_v60, %v574_v1  ;;  %v628_v7 = vsel %vm2886_vm4, %v574_v1, 0 }
  0x25   : > { %2261 = vmatprep.subr.bf16.mxu0 %v2576_v24  ;;  %2417 = vmatprep.subr.bf16.mxu1 %v2577_v27  ;;  %v654_v10 = vshll.u32 %v628_v7, 16  ;;  %v729_v11 = vrot.slane %v628_v7, 1  ;;  %v584_v12 = vor.u32 %v582_v0, %v581_v5  ;;  %v629_v13 = vsel %vm2886_vm4, %v581_v5, 0  ;;  %v2243_v24 = vld [vmem:[%s2825_s23 + $0x18] sm:$0xff]   ;;  %s2953_s23 = scalar_select %p474_p8, 1, 0 }
  0x26   : > { %v2899_v14 = vsel %vm2886_vm4, 0, %v577_v6  ;;  %v732_v15 = vrot.slane %v629_v13, 1  ;;  %v666_v20 = vshll.u32 %v629_v13, 16  ;;  %v2219_v32 = vunpack.c.l.bf16 %v2243_v24 }
  0x27   : > { %v647_v17 = vshrl.u32 %v2899_v14, 16  ;;  %v649_v18 = vshll.u32 %v2899_v14, 16  ;;  %v728_v19 = vrot.slane %v2899_v14, 1  ;;  %v656_v21 = vrot.slane %v654_v10, 1  ;;  %s476_s16 = scvt.s32.f32 %s2953_s23  ;;  %s446_s23 = scalar_lea.vmem %s3211_s2, %s1997_s27 }
  0x28   : > { %2262 = vmatpush3.bf16.msra.mxu0 %v2578_v31  ;;  %2418 = vmatpush3.bf16.msra.mxu1 %v2577_v27  ;;  %v2909_v22 = vsel %vm2886_vm4, 0, %v584_v12  ;;  %v561_v31 = vpack.c.bf16 %v555_v23, %v554_v16  ;;  %v2220_v33 = vunpack.c.h.bf16 %v2243_v24  ;;  %v668_v38 = vrot.slane %v666_v20, 1  ;;  %v2591_v23 = vld [vmem:[%s3216_s7 + $0x60] sm:$0xff]  }
  0x29   : > { %2299 = vmatprep.subr.bf16.mxu0 %v2579_v37  ;;  %2427 = vmatprep.subr.bf16.mxu1 %v2863_v42  ;;  %v651_v25 = vrot.slane %v649_v18, 1  ;;  %v2913_v26 = vsel %vm724_vm2, %v728_v19, %v729_v11  ;;  %v731_v27 = vrot.slane %v2909_v22, 1  ;;  %v659_v28 = vshrl.u32 %v2909_v22, 16  ;;  %v2581_v37 = vld [vmem:[%s3216_s7] sm:$0xff]  }
  0x2a   : > { %2419 = vmatprep.mubr.bf16.mxu1 %v2913_v26  ;;  %v661_v30 = vshll.u32 %v2909_v22, 16  ;;  %v586_v41 = vshrl.u32 %v561_v31, 16  ;;  %v589_v43 = vshll.u32 %v561_v31, 16  ;;  %v540_v44 = vmul.f32 %v2219_v32, %v2852_v36 }
  0x2b   : > { %v652_v34 = vor.u32 %v651_v25, %v647_v17  ;;  %v2924_v35 = vsel %vm724_vm2, %v731_v27, %v732_v15  ;;  %v541_v47 = vmul.f32 %v2220_v33, %v2852_v36  ;;  %v2590_v17 = vld [vmem:[%s3216_s7 + $0x18] sm:$0xff]   ;;  %v502_v25 = vstv %s476_s16  ;;  %s465_s16 = scalar_lea.vmem %s3218_s9, %s2010_s26 }
  0x2c   : > { %2420 = vmatmul.mubr.bf16.vlgmr.msra.gmra.mrb[0].mxu1 %v2924_v35  ;;  %v663_v40 = vrot.slane %v661_v30, 1  ;;  %v588_v50 = vrot.slane %v586_v41, 7  ;;  %v548_v51 = vadd.f32 %v540_v44, %v2865_v45  ;;  %v2595_v30 = vld [vmem:[%s3216_s7 + $0xa8] sm:$0xff]  }
  0x2d   : > { %v2940_v46 = vsel %vm633_vm3, %v652_v34, %v656_v21  ;;  %2428 = vmatpush3.bf16.msra.mxu1 %v2863_v42  ;;  %v549_v52 = vadd.f32 %v541_v47, %v2865_v45  ;;  %v2198_v42 = vld [vmem:[%s426_s24] sm:$0xff]   ;;  %v2594_v41 = vld [vmem:[%s3216_s7 + $0x68] sm:$0xff]   ;;  %v2598_v47 = vld [vmem:[%s3216_s7 + $0xb0] sm:$0xff]  }
  0x2e   : > { %1022 = vmatprep.mubr.bf16.mxu0 %v2940_v46  ;;  %2429 = vmatprep.subr.bf16.mxu1 %v2583_v29  ;;  %v664_v48 = vor.u32 %v663_v40, %v659_v28  ;;  %v591_v55 = vor.u32 %v589_v43, %v588_v50  ;;  %v630_v56 = vsel %vm2886_vm4, %v588_v50, 0  ;;  %v556_v57 = vmax.f32 %v548_v51, 0.0  ;;  %v2593_v40 = vld [vmem:[%s3216_s7 + $0x20] sm:$0xff]  }
  0x2f   : > { %1023 = vmatmul.mubr.bf16.vlgmr.msra.gmra.mrb[0].mxu0 %v2899_v14  ;;  %v678_v60 = vshll.u32 %v630_v56, 16  ;;  %v557_v61 = vmax.f32 %v549_v52, 0.0  ;;  %v2199_v62 = vunpack.c.l.bf16 %v2198_v42  ;;  %v735_v0 = vrot.slane %v630_v56, 1 }
  0x30   : > { %2300 = vmatpush3.bf16.msra.mxu0 %v2581_v37  ;;  %v2959_v54 = vsel %vm633_vm3, %v664_v48, %v668_v38  ;;  %v2972_v63 = vsel %vm2886_vm4, 0, %v591_v55  ;;  %v2200_v1 = vunpack.c.h.bf16 %v2198_v42  ;;  %v2596_v42 = vld [vmem:[%s3216_s7 + $0x28] sm:$0xff]  }
  0x31   : > { %2301 = vmatprep.subr.bf16.mxu0 %v2582_v39  ;;  %2430 = vmatpush3.bf16.msra.mxu1 %v2583_v29  ;;  %v671_v5 = vshrl.u32 %v2972_v63, 16  ;;  %v673_v6 = vshll.u32 %v2972_v63, 16  ;;  %v562_v7 = vpack.c.bf16 %v557_v61, %v556_v57  ;;  %v734_v9 = vrot.slane %v2972_v63, 1  ;;  %v2597_v57 = vld [vmem:[%s3216_s7 + $0x70] sm:$0xff]  }
  0x32   : > { %1030 = vmatprep.mubr.bf16.mxu0 %v2959_v54  ;;  %2431 = vmatprep.subr.bf16.mxu1 %v2586_v49  ;;  %v490_v10 = vmul.f32 %v2199_v62, %v2852_v36  ;;  %v491_v11 = vmul.f32 %v2200_v1, %v2852_v36  ;;  %v680_v13 = vrot.slane %v678_v60, 1  ;;  %v2601_v60 = vld [vmem:[%s3216_s7 + $0xb8] sm:$0xff]   ;;  %v2599_v61 = vld [vmem:[%s3216_s7 + $0x30] sm:$0xff]  }
  0x33   : > { %v675_v12 = vrot.slane %v673_v6, 1  ;;  %v593_v15 = vshrl.u32 %v562_v7, 16  ;;  %v596_v16 = vshll.u32 %v562_v7, 16  ;;  %v2993_v18 = vsel %vm724_vm2, %v734_v9, %v735_v0  ;;  %v2602_v6 = vld [vmem:[%s3216_s7 + $0x38] sm:$0xff]  }
  0x34   : > { %2302 = vmatpush3.bf16.msra.mxu0 %v2584_v53  ;;  %v498_v19 = vadd.f32 %v2865_v45, %v490_v10  ;;  %v499_v20 = vadd.f32 %v2865_v45, %v491_v11  ;;  %2423 = vmatprep.mubr.bf16.mxu1 %v2993_v18  ;;  %v2604_v10 = vld [vmem:[%s3216_s7 + $0x200] sm:$0xff]  }
  0x35   : > { %2303 = vmatprep.subr.bf16.mxu0 %v2585_v58  ;;  %2432 = vmatpush3.bf16.msra.mxu1 %v2586_v49  ;;  %v676_v21 = vor.u32 %v675_v12, %v671_v5  ;;  %v595_v24 = vrot.slane %v593_v15, 7  ;;  %v2603_v15 = vld [vmem:[%s3216_s7 + $0x1c0] sm:$0xff]  }
  0x36   : > { %2433 = vmatprep.subr.bf16.mxu1 %v2589_v59  ;;  %v500_v27 = vmax.f32 %v498_v19, 0.0  ;;  %v501_v28 = vmax.f32 %v499_v20, 0.0  ;;  %v2607_v19 = vld [vmem:[%s3216_s7 + $0x208] sm:$0xff]  }
  0x37   : > { %1031 = vmatmul.mubr.bf16.gmra.mrb[4].mxu0 %v2909_v22  ;;  %v3003_v29 = vsel %vm633_vm3, %v676_v21, %v680_v13  ;;  %v598_v31 = vor.u32 %v596_v16, %v595_v24  ;;  %v631_v32 = vsel %vm2886_vm4, %v595_v24, 0  ;;  %v2605_v24 = vld [vmem:[%s3216_s7 + $0x180] sm:$0xff]  }
  0x38   : > { %2304 = vmatpush3.bf16.msra.mxu0 %v2587_v2  ;;  %1038 = vmatprep.mubr.bf16.mxu0 %v3003_v29  ;;  %v690_v33 = vshll.u32 %v631_v32, 16  ;;  %v738_v34 = vrot.slane %v631_v32, 1  ;;  %v503_v37 = vmul.f32 %v502_v25, %v500_v27  ;;  %v504_v38 = vmul.f32 %v502_v25, %v501_v28  ;;  %v2606_v25 = vld [vmem:[%s3216_s7 + $0x1c8] sm:$0xff]  }
  0x39   : > { %2305 = vmatprep.subr.bf16.mxu0 %v2588_v3  ;;  %2434 = vmatpush3.bf16.msra.mxu1 %v2589_v59  ;;  %v3013_v39 = vsel %vm2886_vm4, 0, %v598_v31  ;;  %v2600_v3 = vld [vmem:[%s3216_s7 + $0x78] sm:$0xff]   ;;  %v2608_v32 = vld [vmem:[%s3216_s7 + $0x188] sm:$0xff]  }
  0x3a   : > { %2435 = vmatprep.subr.bf16.mxu1 %v2592_v8  ;;  %v683_v43 = vshrl.u32 %v3013_v39, 16  ;;  %v685_v44 = vshll.u32 %v3013_v39, 16  ;;  %v737_v48 = vrot.slane %v3013_v39, 1  ;;  %v558_v49 = vpack.c.bf16 %v504_v38, %v503_v37 }
  0x3b   : > { %v692_v51 = vrot.slane %v690_v33, 1  ;;  %v2609_v33 = vld [vmem:[%s3216_s7 + $0x1d0] sm:$0xff]  }
  0x3c   : > { %2306 = vmatpush3.bf16.msra.mxu0 %v2590_v17  ;;  %v687_v50 = vrot.slane %v685_v44, 1  ;;  %v3028_v52 = vsel %vm724_vm2, %v737_v48, %v738_v34  ;;  %v565_v53 = vshrl.u32 %v558_v49, 16  ;;  %v568_v55 = vshll.u32 %v558_v49, 16  ;;  %v2202_v17 = vld [vmem:[%s446_s23] sm:$0xff]   ;;  %v2614_v49 = vld [vmem:[%s3216_s7 + $0x198] sm:$0xff]  }
  0x3d   : > { %2307 = vmatprep.subr.bf16.mxu0 %v2591_v23  ;;  %2436 = vmatpush3.bf16.msra.mxu1 %v2592_v8  ;;  %v2203_v20 = vunpack.c.l.bf16 %v2202_v17  ;;  %v2204_v21 = vunpack.c.h.bf16 %v2202_v17  ;;  %v2616_v44 = vld [vmem:[%s3216_s7 + $0x220] sm:$0xff]  }
  0x3e   : > { %2437 = vmatprep.subr.bf16.mxu1 %v2595_v30  ;;  %2424 = vmatmul.mubr.bf16.gmra.mrb[4].mxu1 %v3028_v52  ;;  %v688_v56 = vor.u32 %v687_v50, %v683_v43  ;;  %v567_v58 = vrot.slane %v565_v53, 7  ;;  %v2619_v50 = vld [vmem:[%s3216_s7 + $0x228] sm:$0xff]   ;;  %v2617_v53 = vld [vmem:[%s3216_s7 + $0x1a0] sm:$0xff]  }
  0x3f   : > { %1039 = vmatmul.mubr.bf16.gmra.mrb[8].mxu0 %v2972_v63  ;;  %v509_v27 = vmul.f32 %v2203_v20, %v2852_v36  ;;  %v510_v28 = vmul.f32 %v2204_v21, %v2852_v36  ;;  %v515_v36 = vstv %s479_s30 }
  0x40   : > { %2308 = vmatpush3.bf16.msra.mxu0 %v2593_v40  ;;  %v3039_v59 = vsel %vm633_vm3, %v688_v56, %v692_v51  ;;  %v570_v62 = vor.u32 %v568_v55, %v567_v58  ;;  %v627_v0 = vsel %vm2886_vm4, %v567_v58, 0 }
  0x41   : > { %2309 = vmatprep.subr.bf16.mxu0 %v2594_v41  ;;  %2438 = vmatpush3.bf16.msra.mxu1 %v2595_v30  ;;  %v642_v1 = vshll.u32 %v627_v0, 16  ;;  %v726_v2 = vrot.slane %v627_v0, 1  ;;  %v511_v30 = vadd.f32 %v509_v27, %v2865_v45  ;;  %v512_v31 = vadd.f32 %v510_v28, %v2865_v45  ;;  %v2613_v45 = vld [vmem:[%s3216_s7 + $0x218] sm:$0xff]   ;;  %v2622_v0 = vld [vmem:[%s3216_s7 + $0x230] sm:$0xff]  }
  0x42   : > { %2439 = vmatprep.subr.bf16.mxu1 %v2598_v47  ;;  %1046 = vmatprep.mubr.bf16.mxu0 %v3039_v59  ;;  %v621_v5 = vsel %vm2886_vm4, 0, %v570_v62  ;;  %v2612_v41 = vld [vmem:[%s3216_s7 + $0x1d8] sm:$0xff]  }
  0x43   : > { %v635_v7 = vshrl.u32 %v621_v5, 16  ;;  %v637_v8 = vshll.u32 %v621_v5, 16  ;;  %v725_v9 = vrot.slane %v621_v5, 1  ;;  %v644_v12 = vrot.slane %v642_v1, 1  ;;  %v2620_v1 = vld [vmem:[%s3216_s7 + $0x1a8] sm:$0xff]  }
  0x44   : > { %2310 = vmatpush3.bf16.msra.mxu0 %v2596_v42  ;;  %v513_v34 = vmax.f32 %v511_v30, 0.0  ;;  %v514_v37 = vmax.f32 %v512_v31, 0.0 }
  0x45   : > { %2311 = vmatprep.subr.bf16.mxu0 %v2597_v57  ;;  %2440 = vmatpush3.bf16.msra.mxu1 %v2598_v47  ;;  %v639_v11 = vrot.slane %v637_v8, 1  ;;  %v727_v13 = vsel %vm724_vm2, %v725_v9, %v726_v2  ;;  %v2618_v57 = vld [vmem:[%s3216_s7 + $0x1e8] sm:$0xff]   ;;  %v2623_v8 = vld [vmem:[%s3216_s7 + $0x1b0] sm:$0xff]  }
  0x46   : > { %2441 = vmatprep.subr.bf16.mxu1 %v2601_v60  ;;  %2443 = vmatprep.mubr.bf16.mxu1 %v727_v13  ;;  %v516_v38 = vmul.f32 %v515_v36, %v513_v34  ;;  %v517_v40 = vmul.f32 %v515_v36, %v514_v37 }
  0x47   : > { %1047 = vmatmul.mubr.bf16.gmra.mrb[12].mxu0 %v3013_v39  ;;  %v640_v16 = vor.u32 %v639_v11, %v635_v7  ;;  %v2625_v7 = vld [vmem:[%s3216_s7 + $0x238] sm:$0xff]  }
  0x48   : > { %2312 = vmatpush3.bf16.msra.mxu0 %v2599_v61  ;;  %v563_v43 = vpack.c.bf16 %v517_v40, %v516_v38  ;;  %v2626_v11 = vld [vmem:[%s3216_s7 + $0x1b8] sm:$0xff]  }
  0x49   : > { %2313 = vmatprep.subr.bf16.mxu0 %v2600_v3  ;;  %2442 = vmatpush3.bf16.msra.mxu1 %v2601_v60  ;;  %v645_v23 = vsel %vm633_vm3, %v640_v16, %v644_v12 }
  0x4a   : > { %2451 = vmatprep.subr.bf16.mxu1 %v2604_v10  ;;  %1296 = vmatprep.mubr.bf16.mxu0 %v645_v23  ;;  %v600_v47 = vshrl.u32 %v563_v43, 16  ;;  %v603_v48 = vshll.u32 %v563_v43, 16 }
  0x4c   : > { %2314 = vmatpush3.bf16.msra.mxu0 %v2602_v6  ;;  %2444 = vmatmul.mubr.bf16.vlgmr.msra.gmra.mrb[0].mxu1 %v2913_v26  ;;  %v2610_v26 = vld [vmem:[%s3216_s7 + $0x210] sm:$0xff]  }
  0x4d   : > { %2351 = vmatprep.subr.bf16.mxu0 %v2603_v15  ;;  %2452 = vmatpush3.bf16.msra.mxu1 %v2604_v10  ;;  %v2624_v10 = vld [vmem:[%s3216_s7 + $0x1f8] sm:$0xff]  }
  0x4e   : > { %2447 = vmatprep.mubr.bf16.mxu1 %v2924_v35  ;;  %2453 = vmatprep.subr.bf16.mxu1 %v2607_v19 }
  0x4f   : > { %1297 = vmatmul.mubr.bf16.vlgmr.msra.gmra.mrb[16].mxu0 %v621_v5  ;;  %v2621_v5 = vld [vmem:[%s3216_s7 + $0x1f0] sm:$0xff]  }
  0x50   : > { %2352 = vmatpush3.bf16.msra.mxu0 %v2605_v24  ;;  %1304 = vmatprep.mubr.bf16.mxu0 %v2940_v46  ;;  %v2611_v46 = vld [vmem:[%s3216_s7 + $0x190] sm:$0xff]  }
  0x51   : > { %2353 = vmatprep.subr.bf16.mxu0 %v2606_v25  ;;  %2454 = vmatpush3.bf16.msra.mxu1 %v2607_v19 }
  0x52   : > { %2455 = vmatprep.subr.bf16.mxu1 %v2610_v26 }
  0x54   : > { %2354 = vmatpush3.bf16.msra.mxu0 %v2608_v32  ;;  %2448 = vmatmul.mubr.bf16.gmra.mrb[4].mxu1 %v2993_v18 }
  0x55   : > { %2355 = vmatprep.subr.bf16.mxu0 %v2609_v33  ;;  %2467 = vmatprep.mubr.bf16.mxu1 %v2924_v35  ;;  %v2615_v35 = vld [vmem:[%s3216_s7 + $0x1e0] sm:$0xff]  }
  0x56   : > { %2456 = vmatpush3.bf16.msra.mxu1 %v2610_v26 }
  0x57   : > { %1305 = vmatmul.mubr.bf16.gmra.mrb[20].mxu0 %v2899_v14  ;;  %2457 = vmatprep.subr.bf16.mxu1 %v2613_v45  ;;  %v602_v14 = vrot.slane %v600_v47, 7 }
  0x58   : > { %2356 = vmatpush3.bf16.msra.mxu0 %v2611_v46  ;;  %1312 = vmatprep.mubr.bf16.mxu0 %v2959_v54 }
  0x59   : > { %2357 = vmatprep.subr.bf16.mxu0 %v2612_v41  ;;  %v605_v51 = vor.u32 %v603_v48, %v602_v14  ;;  %v632_v42 = vsel %vm2886_vm4, %v602_v14, 0 }
  0x5a   : > { %2458 = vmatpush3.bf16.msra.mxu1 %v2613_v45  ;;  %v741_v55 = vrot.slane %v632_v42, 1  ;;  %v702_v56 = vshll.u32 %v632_v42, 16 }
  0x5b   : > { %2459 = vmatprep.subr.bf16.mxu1 %v2616_v44  ;;  %v626_v58 = vsel %vm2886_vm4, 0, %v605_v51 }
  0x5c   : > { %2358 = vmatpush3.bf16.msra.mxu0 %v2614_v49  ;;  %v740_v60 = vrot.slane %v626_v58, 1  ;;  %v695_v61 = vshrl.u32 %v626_v58, 16  ;;  %v697_v62 = vshll.u32 %v626_v58, 16  ;;  %v704_v3 = vrot.slane %v702_v56, 1 }
  0x5d   : > { %2359 = vmatprep.subr.bf16.mxu0 %v2615_v35 }
  0x5e   : > { %2460 = vmatpush3.bf16.msra.mxu1 %v2616_v44  ;;  %v742_v4 = vsel %vm724_vm2, %v740_v60, %v741_v55  ;;  %v699_v2 = vrot.slane %v697_v62, 1 }
  0x5f   : > { %1313 = vmatmul.mubr.bf16.gmra.mrb[24].mxu0 %v2909_v22  ;;  %2461 = vmatprep.subr.bf16.mxu1 %v2619_v50 }
  0x60   : > { %2360 = vmatpush3.bf16.msra.mxu0 %v2617_v53  ;;  %1320 = vmatprep.mubr.bf16.mxu0 %v3003_v29  ;;  %v700_v6 = vor.u32 %v699_v2, %v695_v61 }
  0x61   : > { %2361 = vmatprep.subr.bf16.mxu0 %v2618_v57 }
  0x62   : > { %2462 = vmatpush3.bf16.msra.mxu1 %v2619_v50  ;;  %v705_v9 = vsel %vm633_vm3, %v700_v6, %v704_v3 }
  0x63   : > { %2463 = vmatprep.subr.bf16.mxu1 %v2622_v0 }
  0x64   : > { %2362 = vmatpush3.bf16.msra.mxu0 %v2620_v1 }
  0x65   : > { %2363 = vmatprep.subr.bf16.mxu0 %v2621_v5 }
  0x66   : > { %2464 = vmatpush3.bf16.msra.mxu1 %v2622_v0 }
  0x67   : > { %1321 = vmatmul.mubr.bf16.gmra.mrb[28].mxu0 %v2972_v63  ;;  %2465 = vmatprep.subr.bf16.mxu1 %v2625_v7 }
  0x68   : > { %2364 = vmatpush3.bf16.msra.mxu0 %v2623_v8  ;;  %1619 = vmatprep.mubr.bf16.mxu0 %v2959_v54 }
  0x69   : > { %2365 = vmatprep.subr.bf16.mxu0 %v2624_v10 }
  0x6a   : > { %2466 = vmatpush3.bf16.msra.mxu1 %v2625_v7 }
  0x6c   : > { %2366 = vmatpush3.bf16.msra.mxu0 %v2626_v11 }
  0x6d   : > { %2468 = vmatmul.mubr.bf16.vlgmr.msra.gmra.mrb[0].mxu1 %v2993_v18 }
  0x6e   : > { %2471 = vmatprep.mubr.bf16.mxu1 %v3028_v52 }
  0x6f   : > { %1620 = vmatmul.mubr.bf16.vlgmr.msra.gmra.mrb[32].mxu0 %v2909_v22 }
  0x70   : > { %1627 = vmatprep.mubr.bf16.mxu0 %v3003_v29 }
  0x75   : > { %2472 = vmatmul.mubr.bf16.gmra.mrb[4].mxu1 %v742_v4 }
  0x77   : > { %1628 = vmatmul.mubr.bf16.gmra.mrb[36].mxu0 %v2972_v63 }
  0x78   : > { %1635 = vmatprep.mubr.bf16.mxu0 %v3039_v59 }
  0x7f   : > { %1636 = vmatmul.mubr.bf16.gmra.mrb[40].mxu0 %v3013_v39 }
  0x80   : > { %1643 = vmatprep.mubr.bf16.mxu0 %v705_v9 }
  0x87   : > { %1644 = vmatmul.mubr.bf16.gmra.mrb[44].mxu0 %v626_v58 }
 0x102   : > { %v2263_v54 = vpop.f32.mrb[0].mxu0 }
 0x103   : > { %v2264_v12 = vpop.f32.mrb[1].mxu0 }
 0x104   : > { %v2265_v13 = vadd.f32 %v2264_v12, %v2263_v54  ;;  %v2266_v15 = vpop.f32.mrb[2].mxu0 }
 0x105   : > { %v2267_v18 = vpop.f32.mrb[3].mxu0 }
 0x106   : > { %v2268_v16 = vadd.f32 %v2267_v18, %v2266_v15 }
 0x10a   : > { %v2269_v52 = vpop.f32.mrb[4].mxu0 }
 0x10b   : > { %v2270_v17 = vpop.f32.mrb[5].mxu0 }
 0x10c   : > { %v2271_v22 = vadd.f32 %v2270_v17, %v2269_v52  ;;  %v2272_v19 = vpop.f32.mrb[6].mxu0 }
 0x10d   : > { %v2273_v29 = vpop.f32.mrb[7].mxu0 }
 0x10e   : > { %v2274_v20 = vadd.f32 %v2273_v29, %v2272_v19 }
 0x112   : > { %v2275_v21 = vpop.f32.mrb[8].mxu0 }
 0x113   : > { %v2276_v63 = vpop.f32.mrb[9].mxu0 }
 0x114   : > { %v2277_v23 = vadd.f32 %v2276_v63, %v2275_v21  ;;  %v2278_v59 = vpop.f32.mrb[10].mxu0 }
 0x115   : > { %v2279_v24 = vpop.f32.mrb[11].mxu0 }
 0x116   : > { %v2280_v39 = vadd.f32 %v2279_v24, %v2278_v59 }
 0x11a   : > { %v2281_v25 = vpop.f32.mrb[12].mxu0 }
 0x11b   : > { %v2282_v27 = vpop.f32.mrb[13].mxu0 }
 0x11c   : > { %v2283_v28 = vadd.f32 %v2282_v27, %v2281_v25  ;;  %v2284_v26 = vpop.f32.mrb[14].mxu0 }
 0x11d   : > { %v2285_v30 = vpop.f32.mrb[15].mxu0 }
 0x11e   : > { %v2286_v31 = vadd.f32 %v2285_v30, %v2284_v26 }
 0x122   : > { %v2315_v32 = vpop.f32.mrb[16].mxu0 }
 0x123   : > { %v2316_v36 = vpop.f32.mrb[17].mxu0 }
 0x124   : > { %v2317_v33 = vadd.f32 %v2316_v36, %v2315_v32  ;;  %v2318_v34 = vpop.f32.mrb[18].mxu0 }
 0x125   : > { %v2319_v37 = vpop.f32.mrb[19].mxu0 }
 0x126   : > { %v2478_v45 = vadd.f32 %v2317_v33, %v2265_v13  ;;  %v2320_v38 = vadd.f32 %v2319_v37, %v2318_v34 }
 0x128   : > { %v2484_v40 = vadd.f32 %v2320_v38, %v2268_v16 }
 0x12a   : > { %v2321_v46 = vpop.f32.mrb[20].mxu0 }
 0x12b   : > { %v2322_v41 = vpop.f32.mrb[21].mxu0 }
 0x12c   : > { %v2323_v43 = vadd.f32 %v2322_v41, %v2321_v46  ;;  %v2324_v44 = vpop.f32.mrb[22].mxu0 }
 0x12d   : > { %v2325_v47 = vpop.f32.mrb[23].mxu0 }
 0x12e   : > { %v2475_v48 = vadd.f32 %v2323_v43, %v2271_v22  ;;  %v2326_v49 = vadd.f32 %v2325_v47, %v2324_v44 }
 0x130   : > { %v2481_v35 = vadd.f32 %v2326_v49, %v2274_v20 }
 0x132   : > { %v2327_v14 = vpop.f32.mrb[24].mxu0 }
 0x133   : > { %v2328_v50 = vpop.f32.mrb[25].mxu0 }
 0x134   : > { %v2329_v51 = vadd.f32 %v2328_v50, %v2327_v14  ;;  %v2330_v42 = vpop.f32.mrb[26].mxu0 }
 0x135   : > { %v2331_v53 = vpop.f32.mrb[27].mxu0 }
 0x136   : > { %v2490_v55 = vadd.f32 %v2329_v51, %v2277_v23  ;;  %v2332_v56 = vadd.f32 %v2331_v53, %v2330_v42 }
 0x138   : > { %v2496_v57 = vadd.f32 %v2332_v56, %v2280_v39 }
 0x13a   : > { %v2333_v58 = vpop.f32.mrb[28].mxu0 }
 0x13b   : > { %v2334_v60 = vpop.f32.mrb[29].mxu0 }
 0x13c   : > { %v2335_v61 = vadd.f32 %v2334_v60, %v2333_v58  ;;  %v2336_v62 = vpop.f32.mrb[30].mxu0 }
 0x13d   : > { %v2337_v0 = vpop.f32.mrb[31].mxu0 }
 0x13e   : > { %v3171_v1 = vadd.f32 %v2335_v61, %v2283_v28  ;;  %v2338_v4 = vadd.f32 %v2337_v0, %v2336_v62 }
 0x140   : > { %v3173_v2 = vadd.f32 %v2338_v4, %v2286_v31  ;;  %v2469_v3 = vpop.f32.mrb[0].mxu1 }
 0x141   : > { %v1686_v5 = vpop.f32.mrb[1].mxu1 }
 0x142   : > { %v2367_v6 = vpop.f32.mrb[32].mxu0  ;;  %v2470_v7 = vpop.f32.mrb[2].mxu1 }
 0x143   : > { %v2368_v8 = vpop.f32.mrb[33].mxu0  ;;  %v1689_v9 = vpop.f32.mrb[3].mxu1 }
 0x144   : > { %v2369_v10 = vadd.f32 %v2368_v8, %v2367_v6  ;;  %v2370_v11 = vpop.f32.mrb[34].mxu0 }
 0x145   : > { %v2371_v54 = vpop.f32.mrb[35].mxu0 }
 0x146   : > { %v2479_v12 = vadd.f32 %v2478_v45, %v2369_v10  ;;  %v2372_v13 = vadd.f32 %v2371_v54, %v2370_v11 }
 0x148   : > { %v2480_v15 = vadd.f32 %v2479_v12, %v1686_v5  ;;  %v2485_v18 = vadd.f32 %v2484_v40, %v2372_v13  ;;  %v2473_v16 = vpop.f32.mrb[4].mxu1 }
 0x149   : > { %v1702_v52 = vpop.f32.mrb[5].mxu1 }
 0x14a   : > { %v2486_v17 = vadd.f32 %v2485_v18, %v1689_v9  ;;  %v2373_v22 = vpop.f32.mrb[36].mxu0  ;;  %v2474_v19 = vpop.f32.mrb[6].mxu1  ;;  %v1778_v29 = vmul.f32 %v2480_v15, %v2480_v15 }
 0x14b   : > { %v2374_v20 = vpop.f32.mrb[37].mxu0  ;;  %v1705_v21 = vpop.f32.mrb[7].mxu1 }
 0x14c   : > { %v2224_v63 = vpack.c.bf16 %v2486_v17, %v2480_v15  ;;  %v1765_v23 = vadd.f32 %v2486_v17, %v2480_v15  ;;  %v1779_v59 = vmul.f32 %v2486_v17, %v2486_v17  ;;  %v2375_v24 = vadd.f32 %v2374_v20, %v2373_v22  ;;  %v2376_v39 = vpop.f32.mrb[38].mxu0 }
 0x14d   : > { %v2377_v25 = vpop.f32.mrb[39].mxu0 }
 0x14e   : > { %2225 = vst [vmem:[%s3180_s17] sm:$0xff] %v2224_v63   ;;  %v1786_v27 = vadd.f32 %v1779_v59, %v1778_v29  ;;  %v2476_v28 = vadd.f32 %v2475_v48, %v2375_v24  ;;  %v2378_v26 = vadd.f32 %v2377_v25, %v2376_v39 }
 0x150   : > { %v2477_v30 = vadd.f32 %v2476_v28, %v2469_v3  ;;  %v2482_v31 = vadd.f32 %v2481_v35, %v2378_v26 }
 0x152   : > { %v1766_v32 = vadd.f32 %v2477_v30, %v1765_v23  ;;  %v1780_v36 = vmul.f32 %v2477_v30, %v2477_v30  ;;  %v2483_v33 = vadd.f32 %v2482_v31, %v2470_v7  ;;  %v2379_v34 = vpop.f32.mrb[40].mxu0 }
 0x153   : > { %v2380_v37 = vpop.f32.mrb[41].mxu0 }
 0x154   : > { %v1787_v45 = vadd.f32 %v1786_v27, %v1780_v36  ;;  %v2229_v38 = vpack.c.bf16 %v2483_v33, %v2477_v30  ;;  %v1767_v40 = vadd.f32 %v2483_v33, %v1766_v32  ;;  %v1781_v46 = vmul.f32 %v2483_v33, %v2483_v33  ;;  %v2382_v41 = vpop.f32.mrb[42].mxu0 }
 0x155   : > { %v2381_v43 = vadd.f32 %v2380_v37, %v2379_v34  ;;  %v2383_v44 = vpop.f32.mrb[43].mxu0 }
 0x156   : > { %2244 = vst [vmem:[%s3180_s17 + $0x8] sm:$0xff] %v2229_v38   ;;  %v1788_v47 = vadd.f32 %v1787_v45, %v1781_v46  ;;  %v2384_v49 = vadd.f32 %v2383_v44, %v2382_v41 }
 0x157   : > { %v2491_v48 = vadd.f32 %v2490_v55, %v2381_v43 }
 0x158   : > { %v2497_v14 = vadd.f32 %v2496_v57, %v2384_v49 }
 0x159   : > { %v2492_v50 = vadd.f32 %v2491_v48, %v1702_v52 }
 0x15a   : > { %v2498_v35 = vadd.f32 %v2497_v14, %v1705_v21  ;;  %v2385_v51 = vpop.f32.mrb[44].mxu0 }
 0x15b   : > { %v1768_v42 = vadd.f32 %v2492_v50, %v1767_v40  ;;  %v1782_v53 = vmul.f32 %v2492_v50, %v2492_v50  ;;  %v2386_v56 = vpop.f32.mrb[45].mxu0 }
 0x15c   : > { %v2234_v58 = vpack.c.bf16 %v2498_v35, %v2492_v50  ;;  %v1783_v60 = vmul.f32 %v2498_v35, %v2498_v35  ;;  %v2387_v61 = vadd.f32 %v2386_v56, %v2385_v51  ;;  %v2388_v62 = vpop.f32.mrb[46].mxu0 }
 0x15d   : > { %v1789_v0 = vadd.f32 %v1788_v47, %v1782_v53  ;;  %v1769_v4 = vadd.f32 %v2498_v35, %v1768_v42  ;;  %v2389_v3 = vpop.f32.mrb[47].mxu0 }
 0x15e   : > { %2245 = vst [vmem:[%s3180_s17 + $0x10] sm:$0xff] %v2234_v58   ;;  %v2488_v5 = vadd.f32 %v3171_v1, %v2387_v61  ;;  %v2390_v6 = vadd.f32 %v2389_v3, %v2388_v62 }
 0x15f   : > { %v1790_v55 = vadd.f32 %v1789_v0, %v1783_v60 }
 0x160   : > { %v2489_v57 = vadd.f32 %v2488_v5, %v2473_v16  ;;  %v2494_v7 = vadd.f32 %v3173_v2, %v2390_v6 }
 0x162   : > { %v1770_v8 = vadd.f32 %v2489_v57, %v1769_v4  ;;  %v1784_v9 = vmul.f32 %v2489_v57, %v2489_v57  ;;  %v2495_v10 = vadd.f32 %v2494_v7, %v2474_v19 }
 0x164   : > { %v1791_v11 = vadd.f32 %v1790_v55, %v1784_v9  ;;  %v2239_v54 = vpack.c.bf16 %v2495_v10, %v2489_v57  ;;  %v1771_v12 = vadd.f32 %v2495_v10, %v1770_v8  ;;  %v1785_v13 = vmul.f32 %v2495_v10, %v2495_v10 }
 0x166   : > { %2246 = vst [vmem:[%s3180_s17 + $0x18] sm:$0xff] %v2239_v54   ;;  %v1772_v15 = vrot.slane %v1771_v12, 4  ;;  %v1792_v18 = vadd.f32 %v1791_v11, %v1785_v13 }
 0x168   : > { %v1773_v52 = vadd.f32 %v1772_v15, %v1771_v12  ;;  %v1793_v17 = vrot.slane %v1792_v18, 4 }
 0x16a   : > { %v1774_v1 = vrot.slane %v1773_v52, 2  ;;  %v1794_v22 = vadd.f32 %v1793_v17, %v1792_v18 }
 0x16c   : > { %v1775_v16 = vadd.f32 %v1774_v1, %v1773_v52  ;;  %v1795_v29 = vrot.slane %v1794_v22, 2 }
 0x16e   : > { %v1776_v2 = vrot.slane %v1775_v16, 1  ;;  %v1796_v20 = vadd.f32 %v1795_v29, %v1794_v22 }
 0x170   : > { %v1797_v21 = vrot.slane %v1796_v20, 1  ;;  %v1777_v19 = vadd.f32 %v1776_v2, %v1775_v16 }
 0x172   : > { %v1798_v63 = vadd.f32 %v1797_v21, %v1796_v20 }
 0x174   : > { %v1800_v23 = vsel %vm618_vm0, %v1777_v19, %v1798_v63 }
 0x175   : > { %1801 = vst [vmem:[%s465_s16] sm:$0x3] %v1800_v23 }
 0x176 PF: > { %s20_s13 = sadd.s32 1, %s2665_s13   ;;  %s3221_s30 = smov %s2657_s11 }
 0x177   : > { %p17_p9 = scmp.ge.s32.totalorder %s20_s13, 10   ;;  %s3222_s10 = smov %s2661_s12 }
 0x178   : > { %s3223_s11 = smov %s3226_s14  ;;  %s3224_s12 = smov %s3230_s15 }
 0x179   :  { %19 = sbr.rel (!%p17_p9) target bundleno = 3 (0x3), region = 102 }

</bundles_post_ra>
